<compile_context>
chip_gen: v7x
topology: tpu7x:2x2x1
jax: 0.10.0
libtpu: 0.0.40
codegen_flags: <defaults>
</compile_context>

<pallas_src>
import functools

import jax
import jax.numpy as jnp
from jax.experimental import pallas as pl
from jax.experimental.pallas import tpu as pltpu

EPS = 1e-5  # PyTorch BatchNorm default eps

# ---------------------------------------------------------------------------
# Packed parameter layouts (3 kernel inputs total: x, weight slab, misc slab).
#
#  * misc (8, 1152) f32: row 0 = BN gammas, row 1 = BN betas (128-aligned
#    column offsets per layer); rows 2..4 cols 0:64 = conv1 weight (3,64);
#    row 5 cols 0:16 = fc4 weight row; row 6 col 0 = fc4 bias.
#  * wslab (1088, 256) bf16: every MXU weight stacked along rows at
#    16-aligned row offsets; fc1 pre-split into the 256/128/64-row blocks
#    multiplying the pooled [x_256, x_128, x_64] features.
# ---------------------------------------------------------------------------

_BN_LAYOUT = {   # name -> (column offset, channels); offsets 128-aligned
    "bn1":  (0,    64),
    "bn2":  (128,  64),
    "bn3":  (256, 128),
    "bn4":  (384, 256),
    "fbn1": (640, 256),
    "fbn2": (896, 128),
    "fbn3": (1024, 16),
}
_MISC_ROWS = 8
_MISC_COLS = 1152

_W_LAYOUT = {    # name -> (row offset, K, N); row offsets multiples of 16
    "w2":   (0,    64,  64),
    "w3":   (64,   64, 128),
    "w4":   (128, 128, 256),
    "fw1a": (256, 256, 256),   # multiplies pooled x_256
    "fw1b": (512, 128, 256),   # multiplies pooled x_128
    "fw1c": (640,  64, 256),   # multiplies pooled x_64
    "fw2":  (704, 256, 128),
    "fw3":  (960, 128,  16),
}
_W_SLAB_ROWS = 1088
_W_SLAB_COLS = 256


def dnet_kernel(B, N, x_ref, w_ref, misc_ref, o_ref):
    inv_bn = 1.0 / float(B * N)   # conv-stage BN normalizer
    inv_b = 1.0 / float(B)        # fc-stage BN normalizer

    mp = misc_ref[...]            # (8, 1152) f32, ~36 KiB; loaded once

    def bn_relu(h, name, inv_n):
        """Training-mode BN folded to one scale/shift FMA, ReLU, cast bf16."""
        off, c = _BN_LAYOUT[name]
        # Fused single-pass batch stats (sum / sum of squares) in f32.
        # NOTE: E[x^2]-mean^2 can cancel at very large B*N; fine at this
        # scale — switch to centered two-pass stats with the tiled variant.
        s1 = jnp.sum(h, axis=0, keepdims=True)
        s2 = jnp.sum(h * h, axis=0, keepdims=True)
        mu = s1 * inv_n
        var = jnp.maximum(s2 * inv_n - mu * mu, 0.0)
        g = mp[0:1, off:off + c]
        be = mp[1:2, off:off + c]
        scale = g * jax.lax.rsqrt(var + EPS)        # rsqrt -> EUP (free slot)
        shift = be - mu * scale
        # 2-op (FMA-able) per-element normalize; emit bf16 so the following
        # matmul / pool read half the bytes.
        return jnp.maximum(h * scale + shift, 0.0).astype(jnp.bfloat16)

    def mm(h_bf16, name):
        off, k, n = _W_LAYOUT[name]
        return jnp.dot(h_bf16, w_ref[off:off + k, 0:n],
                       preferred_element_type=jnp.float32)

    def pool(h_bf16, c):
        # MaxPool2d((N,1)) == per-example max over the N points (one axis-1
        # reduce).  Values are post-ReLU (>= 0).  Keep N a multiple of 8 so
        # the reshape stays sublane-aligned (no hidden relayout copy).
        return jnp.max(h_bf16.reshape(B, N, c), axis=1)

    x = x_ref[...]                               # (B*N, 3) f32

    # conv1 (kernel (1,3)) on the VPU as 3 broadcast FMAs; an MXU pass would
    # pad K=3 to 128/256 and waste >97% of the pushes.  Conv/fc biases that
    # feed a training-mode BN are dropped everywhere: a per-channel constant
    # shift cancels exactly in the mean subtraction and leaves var unchanged.
    h1p = (x[:, 0:1] * mp[2:3, 0:64] +
           x[:, 1:2] * mp[3:4, 0:64] +
           x[:, 2:3] * mp[4:5, 0:64])
    h1 = bn_relu(h1p, "bn1", inv_bn)             # (B*N, 64)  bf16

    # Pool each tensor immediately after it is produced so its live range
    # ends right after the next matmul consumes it (lower peak VMEM).
    h2 = bn_relu(mm(h1, "w2"), "bn2", inv_bn)    # x_64   (B*N, 64)
    p2 = pool(h2, 64)
    h3 = bn_relu(mm(h2, "w3"), "bn3", inv_bn)    # x_128  (B*N, 128)
    p3 = pool(h3, 128)
    h4 = bn_relu(mm(h3, "w4"), "bn4", inv_bn)    # x_256  (B*N, 256)
    p4 = pool(h4, 256)

    # fc1 without materializing the (B, 448) concat: fw1 is pre-split into
    # the row blocks matching cat([x_256, x_128, x_64], dim=1).
    f1p = mm(p4, "fw1a") + mm(p3, "fw1b") + mm(p2, "fw1c")
    f1 = bn_relu(f1p, "fbn1", inv_b)             # (B, 256)
    f2 = bn_relu(mm(f1, "fw2"), "fbn2", inv_b)   # (B, 128)
    f3 = bn_relu(mm(f2, "fw3"), "fbn3", inv_b)   # (B, 16)

    # fc4: K=16, N=1 -> VPU multiply + lane reduce (MXU pass would be >99%
    # idle in the latency-bound fc tail).  Final layer keeps its bias.
    w4row = mp[5:6, 0:16]                        # (1, 16) f32
    fb4 = mp[6:7, 0:1]                           # (1, 1)  f32
    o_ref[...] = jnp.sum(f3.astype(jnp.float32) * w4row,
                         axis=-1, keepdims=True) + fb4


def init_params(key):
    """Deterministic synthetic parameters (PyTorch-style uniform(-1/sqrt(fan_in)))."""
    def dense(k, fan_in, fan_out):
        kw, kb = jax.random.split(k)
        bound = 1.0 / float(fan_in) ** 0.5
        w = jax.random.uniform(kw, (fan_in, fan_out), jnp.float32, -bound, bound)
        b = jax.random.uniform(kb, (1, fan_out), jnp.float32, -bound, bound)
        return w, b

    def bn(c):
        return jnp.ones((1, c), jnp.float32), jnp.zeros((1, c), jnp.float32)

    keys = jax.random.split(key, 8)
    p = {}
    # conv1: Conv2d(1, 64, (1,3)) -> fan_in = 1*1*3 = 3
    p["w1"], p["b1"] = dense(keys[0], 3, 64)
    p["w2"], p["b2"] = dense(keys[1], 64, 64)
    p["w3"], p["b3"] = dense(keys[2], 64, 128)
    p["w4"], p["b4"] = dense(keys[3], 128, 256)
    p["g1"], p["be1"] = bn(64)
    p["g2"], p["be2"] = bn(64)
    p["g3"], p["be3"] = bn(128)
    p["g4"], p["be4"] = bn(256)
    p["fw1"], p["fb1"] = dense(keys[4], 448, 256)
    p["fw2"], p["fb2"] = dense(keys[5], 256, 128)
    p["fw3"], p["fb3"] = dense(keys[6], 128, 16)
    p["fw4"], p["fb4"] = dense(keys[7], 16, 1)
    p["fg1"], p["fbe1"] = bn(256)
    p["fg2"], p["fbe2"] = bn(128)
    p["fg3"], p["fbe3"] = bn(16)
    return p


def _pack_misc(p):
    """Pack BN gamma/beta + conv1 weight + fc4 weight/bias into one f32 slab."""
    m = jnp.zeros((_MISC_ROWS, _MISC_COLS), jnp.float32)
    pairs = {"bn1": ("g1", "be1"), "bn2": ("g2", "be2"), "bn3": ("g3", "be3"),
             "bn4": ("g4", "be4"), "fbn1": ("fg1", "fbe1"),
             "fbn2": ("fg2", "fbe2"), "fbn3": ("fg3", "fbe3")}
    for name, (gk, bk) in pairs.items():
        off, c = _BN_LAYOUT[name]
        m = m.at[0, off:off + c].set(p[gk][0])
        m = m.at[1, off:off + c].set(p[bk][0])
    m = m.at[2:5, 0:64].set(p["w1"])              # conv1 weight (3, 64)
    m = m.at[5, 0:16].set(p["fw4"][:, 0])         # fc4 weight row (16,)
    m = m.at[6, 0].set(p["fb4"][0, 0])            # fc4 bias
    return m


def _pack_weights(p):
    """Pack all MXU weights into one bf16 slab at 16-aligned row offsets."""
    s = jnp.zeros((_W_SLAB_ROWS, _W_SLAB_COLS), jnp.bfloat16)

    def put(s, name, w):
        off, k, n = _W_LAYOUT[name]
        assert w.shape == (k, n), (name, w.shape, (k, n))
        return s.at[off:off + k, 0:n].set(w.astype(jnp.bfloat16))

    s = put(s, "w2", p["w2"])
    s = put(s, "w3", p["w3"])
    s = put(s, "w4", p["w4"])
    s = put(s, "fw1a", p["fw1"][0:256])           # rows for pooled x_256
    s = put(s, "fw1b", p["fw1"][256:384])         # rows for pooled x_128
    s = put(s, "fw1c", p["fw1"][384:448])         # rows for pooled x_64
    s = put(s, "fw2", p["fw2"])
    s = put(s, "fw3", p["fw3"])
    return s


def d_net_forward(x_nchw, params, num_center_point):
    B = x_nchw.shape[0]
    N = num_center_point
    assert x_nchw.shape == (B, 1, N, 3)
    # NCHW (B,1,N,3) -> (B*N, 3): channels-last rows for the kernel.
    x2d = x_nchw.reshape(B * N, 3).astype(jnp.float32)

    wslab = _pack_weights(params)
    misc = _pack_misc(params)

    kernel = functools.partial(dnet_kernel, B, N)
    vmem = pl.BlockSpec(memory_space=pltpu.MemorySpace.VMEM)

    # Single-block kernel: all B*N rows VMEM-resident (the right shape for
    # the launch/DMA-latency-bound small-B*N regime).  Scoped-VMEM limit
    # sized from the real footprint: x2d lane-pads 3 -> 128 (512 B/row),
    # bf16 activations h1..h4 (~1 KiB/row), f32 pre-activation temporaries
    # (~2 KiB/row), plus the ~0.6 MiB weight slab and headroom.  Clamp to
    # 48 MiB so v7x (64 MiB physical VMEM) keeps compiler-scratch headroom.
    per_row = 128 * 4 + (64 + 64 + 128 + 256) * 2 + 2 * 256 * 4
    est_vmem = B * N * per_row + (4 << 20)
    vmem_limit = int(min(48 << 20, max(16 << 20, est_vmem)))

    out = pl.pallas_call(
        kernel,
        out_shape=jax.ShapeDtypeStruct((B, 1), jnp.float32),
        in_specs=[vmem, vmem, vmem],
        out_specs=vmem,
        compiler_params=pltpu.CompilerParams(vmem_limit_bytes=vmem_limit),
    )(x2d, wslab, misc)
    return out


if __name__ == "__main__":
    key = jax.random.PRNGKey(0)
    kx, kp = jax.random.split(key)

    B = 2
    num_center_point = 8   # N; multiple of 8 keeps the pool reshape aligned
    x = jax.random.normal(kx, (B, 1, num_center_point, 3), jnp.float32)  # NCHW

    params = init_params(kp)
    out = d_net_forward(x, params, num_center_point)
    jax.block_until_ready(out)
    assert out.shape == (B, 1) and out.dtype == jnp.float32
    print("KERNEL_OK")
</pallas_src>

<mosaic_0001>
module attributes {stable_mosaic.version = 11 : i64} {
  func.func @dnet_kernel(%arg0: memref<16x3xf32, #tpu.memory_space<vmem>>, %arg1: memref<1088x256xbf16, #tpu.memory_space<vmem>>, %arg2: memref<8x1152xf32, #tpu.memory_space<vmem>>, %arg3: memref<2x1xf32, #tpu.memory_space<vmem>>) attributes {dimension_semantics = [], scalar_prefetch = 0 : i64, scratch_operands = 0 : i64, tpu.core_type = #tpu.core_type<tc>} {
    %c0 = arith.constant 0 : index
    %c0_0 = arith.constant 0 : index
    %0 = vector.load %arg2[%c0, %c0_0] : memref<8x1152xf32, #tpu.memory_space<vmem>>, vector<8x1152xf32>
    %c0_1 = arith.constant 0 : index
    %c0_2 = arith.constant 0 : index
    %1 = vector.load %arg0[%c0_1, %c0_2] : memref<16x3xf32, #tpu.memory_space<vmem>>, vector<16x3xf32>
    %2 = vector.extract_strided_slice %1 {offsets = [0, 0], sizes = [16, 1], strides = [1, 1]} : vector<16x3xf32> to vector<16x1xf32>
    %3 = vector.extract_strided_slice %0 {offsets = [2, 0], sizes = [1, 64], strides = [1, 1]} : vector<8x1152xf32> to vector<1x64xf32>
    %4 = vector.broadcast %2 : vector<16x1xf32> to vector<16x64xf32>
    %5 = vector.broadcast %3 : vector<1x64xf32> to vector<16x64xf32>
    %6 = arith.mulf %4, %5 : vector<16x64xf32>
    %7 = vector.extract_strided_slice %1 {offsets = [0, 1], sizes = [16, 1], strides = [1, 1]} : vector<16x3xf32> to vector<16x1xf32>
    %8 = vector.extract_strided_slice %0 {offsets = [3, 0], sizes = [1, 64], strides = [1, 1]} : vector<8x1152xf32> to vector<1x64xf32>
    %9 = vector.broadcast %7 : vector<16x1xf32> to vector<16x64xf32>
    %10 = vector.broadcast %8 : vector<1x64xf32> to vector<16x64xf32>
    %11 = arith.mulf %9, %10 : vector<16x64xf32>
    %12 = arith.addf %6, %11 : vector<16x64xf32>
    %13 = vector.extract_strided_slice %1 {offsets = [0, 2], sizes = [16, 1], strides = [1, 1]} : vector<16x3xf32> to vector<16x1xf32>
    %14 = vector.extract_strided_slice %0 {offsets = [4, 0], sizes = [1, 64], strides = [1, 1]} : vector<8x1152xf32> to vector<1x64xf32>
    %15 = vector.broadcast %13 : vector<16x1xf32> to vector<16x64xf32>
    %16 = vector.broadcast %14 : vector<1x64xf32> to vector<16x64xf32>
    %17 = arith.mulf %15, %16 : vector<16x64xf32>
    %18 = arith.addf %12, %17 : vector<16x64xf32>
    %cst = arith.constant dense<0.000000e+00> : vector<64xf32>
    %19 = vector.multi_reduction <add>, %18, %cst [0] : vector<16x64xf32> to vector<64xf32>
    %20 = vector.shape_cast %19 : vector<64xf32> to vector<1x64xf32>
    %21 = arith.mulf %18, %18 : vector<16x64xf32>
    %cst_3 = arith.constant dense<0.000000e+00> : vector<64xf32>
    %22 = vector.multi_reduction <add>, %21, %cst_3 [0] : vector<16x64xf32> to vector<64xf32>
    %23 = vector.shape_cast %22 : vector<64xf32> to vector<1x64xf32>
    %cst_4 = arith.constant 6.250000e-02 : f32
    %24 = vector.broadcast %cst_4 : f32 to vector<1x64xf32>
    %25 = arith.mulf %20, %24 : vector<1x64xf32>
    %cst_5 = arith.constant 6.250000e-02 : f32
    %26 = vector.broadcast %cst_5 : f32 to vector<1x64xf32>
    %27 = arith.mulf %23, %26 : vector<1x64xf32>
    %28 = arith.mulf %25, %25 : vector<1x64xf32>
    %29 = arith.subf %27, %28 : vector<1x64xf32>
    %cst_6 = arith.constant 0.000000e+00 : f32
    %30 = vector.broadcast %cst_6 : f32 to vector<1x64xf32>
    %31 = arith.maximumf %29, %30 : vector<1x64xf32>
    %32 = vector.extract_strided_slice %0 {offsets = [0, 0], sizes = [1, 64], strides = [1, 1]} : vector<8x1152xf32> to vector<1x64xf32>
    %33 = vector.extract_strided_slice %0 {offsets = [1, 0], sizes = [1, 64], strides = [1, 1]} : vector<8x1152xf32> to vector<1x64xf32>
    %cst_7 = arith.constant 9.99999974E-6 : f32
    %34 = vector.broadcast %cst_7 : f32 to vector<1x64xf32>
    %35 = arith.addf %31, %34 : vector<1x64xf32>
    %36 = math.rsqrt %35 : vector<1x64xf32>
    %37 = arith.mulf %32, %36 : vector<1x64xf32>
    %38 = arith.mulf %25, %37 : vector<1x64xf32>
    %39 = arith.subf %33, %38 : vector<1x64xf32>
    %40 = vector.broadcast %37 : vector<1x64xf32> to vector<16x64xf32>
    %41 = arith.mulf %18, %40 : vector<16x64xf32>
    %42 = vector.broadcast %39 : vector<1x64xf32> to vector<16x64xf32>
    %43 = arith.addf %41, %42 : vector<16x64xf32>
    %cst_8 = arith.constant 0.000000e+00 : f32
    %44 = vector.broadcast %cst_8 : f32 to vector<16x64xf32>
    %45 = arith.maximumf %43, %44 : vector<16x64xf32>
    %46 = arith.truncf %45 : vector<16x64xf32> to vector<16x64xbf16>
    %c0_9 = arith.constant 0 : index
    %c0_10 = arith.constant 0 : index
    %47 = vector.load %arg1[%c0_9, %c0_10] : memref<1088x256xbf16, #tpu.memory_space<vmem>>, vector<64x64xbf16>
    %cst_11 = arith.constant dense<0.000000e+00> : vector<16x64xf32>
    %48 = tpu.matmul %46, %47, %cst_11 {dimension_numbers = #tpu.dot_dimension_numbers<[1], [0], [0], [1], [0, 0, 1, 1], [], []>} : vector<16x64xbf16>, vector<64x64xbf16>, vector<16x64xf32> -> vector<16x64xf32>
    %cst_12 = arith.constant dense<0.000000e+00> : vector<64xf32>
    %49 = vector.multi_reduction <add>, %48, %cst_12 [0] : vector<16x64xf32> to vector<64xf32>
    %50 = vector.shape_cast %49 : vector<64xf32> to vector<1x64xf32>
    %51 = arith.mulf %48, %48 : vector<16x64xf32>
    %cst_13 = arith.constant dense<0.000000e+00> : vector<64xf32>
    %52 = vector.multi_reduction <add>, %51, %cst_13 [0] : vector<16x64xf32> to vector<64xf32>
    %53 = vector.shape_cast %52 : vector<64xf32> to vector<1x64xf32>
    %cst_14 = arith.constant 6.250000e-02 : f32
    %54 = vector.broadcast %cst_14 : f32 to vector<1x64xf32>
    %55 = arith.mulf %50, %54 : vector<1x64xf32>
    %cst_15 = arith.constant 6.250000e-02 : f32
    %56 = vector.broadcast %cst_15 : f32 to vector<1x64xf32>
    %57 = arith.mulf %53, %56 : vector<1x64xf32>
    %58 = arith.mulf %55, %55 : vector<1x64xf32>
    %59 = arith.subf %57, %58 : vector<1x64xf32>
    %cst_16 = arith.constant 0.000000e+00 : f32
    %60 = vector.broadcast %cst_16 : f32 to vector<1x64xf32>
    %61 = arith.maximumf %59, %60 : vector<1x64xf32>
    %62 = vector.extract_strided_slice %0 {offsets = [0, 128], sizes = [1, 64], strides = [1, 1]} : vector<8x1152xf32> to vector<1x64xf32>
    %63 = vector.extract_strided_slice %0 {offsets = [1, 128], sizes = [1, 64], strides = [1, 1]} : vector<8x1152xf32> to vector<1x64xf32>
    %cst_17 = arith.constant 9.99999974E-6 : f32
    %64 = vector.broadcast %cst_17 : f32 to vector<1x64xf32>
    %65 = arith.addf %61, %64 : vector<1x64xf32>
    %66 = math.rsqrt %65 : vector<1x64xf32>
    %67 = arith.mulf %62, %66 : vector<1x64xf32>
    %68 = arith.mulf %55, %67 : vector<1x64xf32>
    %69 = arith.subf %63, %68 : vector<1x64xf32>
    %70 = vector.broadcast %67 : vector<1x64xf32> to vector<16x64xf32>
    %71 = arith.mulf %48, %70 : vector<16x64xf32>
    %72 = vector.broadcast %69 : vector<1x64xf32> to vector<16x64xf32>
    %73 = arith.addf %71, %72 : vector<16x64xf32>
    %cst_18 = arith.constant 0.000000e+00 : f32
    %74 = vector.broadcast %cst_18 : f32 to vector<16x64xf32>
    %75 = arith.maximumf %73, %74 : vector<16x64xf32>
    %76 = arith.truncf %75 : vector<16x64xf32> to vector<16x64xbf16>
    %77 = vector.shape_cast %76 : vector<16x64xbf16> to vector<2x8x64xbf16>
    %cst_19 = arith.constant dense<0xFF80> : vector<2x64xbf16>
    %78 = vector.multi_reduction <maximumf>, %77, %cst_19 [1] : vector<2x8x64xbf16> to vector<2x64xbf16>
    %c64 = arith.constant 64 : index
    %c0_20 = arith.constant 0 : index
    %79 = vector.load %arg1[%c64, %c0_20] : memref<1088x256xbf16, #tpu.memory_space<vmem>>, vector<64x128xbf16>
    %cst_21 = arith.constant dense<0.000000e+00> : vector<16x128xf32>
    %80 = tpu.matmul %76, %79, %cst_21 {dimension_numbers = #tpu.dot_dimension_numbers<[1], [0], [0], [1], [0, 0, 1, 1], [], []>} : vector<16x64xbf16>, vector<64x128xbf16>, vector<16x128xf32> -> vector<16x128xf32>
    %cst_22 = arith.constant dense<0.000000e+00> : vector<128xf32>
    %81 = vector.multi_reduction <add>, %80, %cst_22 [0] : vector<16x128xf32> to vector<128xf32>
    %82 = vector.shape_cast %81 : vector<128xf32> to vector<1x128xf32>
    %83 = arith.mulf %80, %80 : vector<16x128xf32>
    %cst_23 = arith.constant dense<0.000000e+00> : vector<128xf32>
    %84 = vector.multi_reduction <add>, %83, %cst_23 [0] : vector<16x128xf32> to vector<128xf32>
    %85 = vector.shape_cast %84 : vector<128xf32> to vector<1x128xf32>
    %cst_24 = arith.constant 6.250000e-02 : f32
    %86 = vector.broadcast %cst_24 : f32 to vector<1x128xf32>
    %87 = arith.mulf %82, %86 : vector<1x128xf32>
    %cst_25 = arith.constant 6.250000e-02 : f32
    %88 = vector.broadcast %cst_25 : f32 to vector<1x128xf32>
    %89 = arith.mulf %85, %88 : vector<1x128xf32>
    %90 = arith.mulf %87, %87 : vector<1x128xf32>
    %91 = arith.subf %89, %90 : vector<1x128xf32>
    %cst_26 = arith.constant 0.000000e+00 : f32
    %92 = vector.broadcast %cst_26 : f32 to vector<1x128xf32>
    %93 = arith.maximumf %91, %92 : vector<1x128xf32>
    %94 = vector.extract_strided_slice %0 {offsets = [0, 256], sizes = [1, 128], strides = [1, 1]} : vector<8x1152xf32> to vector<1x128xf32>
    %95 = vector.extract_strided_slice %0 {offsets = [1, 256], sizes = [1, 128], strides = [1, 1]} : vector<8x1152xf32> to vector<1x128xf32>
    %cst_27 = arith.constant 9.99999974E-6 : f32
    %96 = vector.broadcast %cst_27 : f32 to vector<1x128xf32>
    %97 = arith.addf %93, %96 : vector<1x128xf32>
    %98 = math.rsqrt %97 : vector<1x128xf32>
    %99 = arith.mulf %94, %98 : vector<1x128xf32>
    %100 = arith.mulf %87, %99 : vector<1x128xf32>
    %101 = arith.subf %95, %100 : vector<1x128xf32>
    %102 = vector.broadcast %99 : vector<1x128xf32> to vector<16x128xf32>
    %103 = arith.mulf %80, %102 : vector<16x128xf32>
    %104 = vector.broadcast %101 : vector<1x128xf32> to vector<16x128xf32>
    %105 = arith.addf %103, %104 : vector<16x128xf32>
    %cst_28 = arith.constant 0.000000e+00 : f32
    %106 = vector.broadcast %cst_28 : f32 to vector<16x128xf32>
    %107 = arith.maximumf %105, %106 : vector<16x128xf32>
    %108 = arith.truncf %107 : vector<16x128xf32> to vector<16x128xbf16>
    %109 = vector.shape_cast %108 : vector<16x128xbf16> to vector<2x8x128xbf16>
    %cst_29 = arith.constant dense<0xFF80> : vector<2x128xbf16>
    %110 = vector.multi_reduction <maximumf>, %109, %cst_29 [1] : vector<2x8x128xbf16> to vector<2x128xbf16>
    %c128 = arith.constant 128 : index
    %c0_30 = arith.constant 0 : index
    %111 = vector.load %arg1[%c128, %c0_30] : memref<1088x256xbf16, #tpu.memory_space<vmem>>, vector<128x256xbf16>
    %cst_31 = arith.constant dense<0.000000e+00> : vector<16x256xf32>
    %112 = tpu.matmul %108, %111, %cst_31 {dimension_numbers = #tpu.dot_dimension_numbers<[1], [0], [0], [1], [0, 0, 1, 1], [], []>} : vector<16x128xbf16>, vector<128x256xbf16>, vector<16x256xf32> -> vector<16x256xf32>
    %cst_32 = arith.constant dense<0.000000e+00> : vector<256xf32>
    %113 = vector.multi_reduction <add>, %112, %cst_32 [0] : vector<16x256xf32> to vector<256xf32>
    %114 = vector.shape_cast %113 : vector<256xf32> to vector<1x256xf32>
    %115 = arith.mulf %112, %112 : vector<16x256xf32>
    %cst_33 = arith.constant dense<0.000000e+00> : vector<256xf32>
    %116 = vector.multi_reduction <add>, %115, %cst_33 [0] : vector<16x256xf32> to vector<256xf32>
    %117 = vector.shape_cast %116 : vector<256xf32> to vector<1x256xf32>
    %cst_34 = arith.constant 6.250000e-02 : f32
    %118 = vector.broadcast %cst_34 : f32 to vector<1x256xf32>
    %119 = arith.mulf %114, %118 : vector<1x256xf32>
    %cst_35 = arith.constant 6.250000e-02 : f32
    %120 = vector.broadcast %cst_35 : f32 to vector<1x256xf32>
    %121 = arith.mulf %117, %120 : vector<1x256xf32>
    %122 = arith.mulf %119, %119 : vector<1x256xf32>
    %123 = arith.subf %121, %122 : vector<1x256xf32>
    %cst_36 = arith.constant 0.000000e+00 : f32
    %124 = vector.broadcast %cst_36 : f32 to vector<1x256xf32>
    %125 = arith.maximumf %123, %124 : vector<1x256xf32>
    %126 = vector.extract_strided_slice %0 {offsets = [0, 384], sizes = [1, 256], strides = [1, 1]} : vector<8x1152xf32> to vector<1x256xf32>
    %127 = vector.extract_strided_slice %0 {offsets = [1, 384], sizes = [1, 256], strides = [1, 1]} : vector<8x1152xf32> to vector<1x256xf32>
    %cst_37 = arith.constant 9.99999974E-6 : f32
    %128 = vector.broadcast %cst_37 : f32 to vector<1x256xf32>
    %129 = arith.addf %125, %128 : vector<1x256xf32>
    %130 = math.rsqrt %129 : vector<1x256xf32>
    %131 = arith.mulf %126, %130 : vector<1x256xf32>
    %132 = arith.mulf %119, %131 : vector<1x256xf32>
    %133 = arith.subf %127, %132 : vector<1x256xf32>
    %134 = vector.broadcast %131 : vector<1x256xf32> to vector<16x256xf32>
    %135 = arith.mulf %112, %134 : vector<16x256xf32>
    %136 = vector.broadcast %133 : vector<1x256xf32> to vector<16x256xf32>
    %137 = arith.addf %135, %136 : vector<16x256xf32>
    %cst_38 = arith.constant 0.000000e+00 : f32
    %138 = vector.broadcast %cst_38 : f32 to vector<16x256xf32>
    %139 = arith.maximumf %137, %138 : vector<16x256xf32>
    %140 = arith.truncf %139 : vector<16x256xf32> to vector<16x256xbf16>
    %141 = vector.shape_cast %140 : vector<16x256xbf16> to vector<2x8x256xbf16>
    %cst_39 = arith.constant dense<0xFF80> : vector<2x256xbf16>
    %142 = vector.multi_reduction <maximumf>, %141, %cst_39 [1] : vector<2x8x256xbf16> to vector<2x256xbf16>
    %c256 = arith.constant 256 : index
    %c0_40 = arith.constant 0 : index
    %143 = vector.load %arg1[%c256, %c0_40] : memref<1088x256xbf16, #tpu.memory_space<vmem>>, vector<256x256xbf16>
    %cst_41 = arith.constant dense<0.000000e+00> : vector<2x256xf32>
    %144 = tpu.matmul %142, %143, %cst_41 {dimension_numbers = #tpu.dot_dimension_numbers<[1], [0], [0], [1], [0, 0, 1, 1], [], []>} : vector<2x256xbf16>, vector<256x256xbf16>, vector<2x256xf32> -> vector<2x256xf32>
    %c512 = arith.constant 512 : index
    %c0_42 = arith.constant 0 : index
    %145 = vector.load %arg1[%c512, %c0_42] : memref<1088x256xbf16, #tpu.memory_space<vmem>>, vector<128x256xbf16>
    %cst_43 = arith.constant dense<0.000000e+00> : vector<2x256xf32>
    %146 = tpu.matmul %110, %145, %cst_43 {dimension_numbers = #tpu.dot_dimension_numbers<[1], [0], [0], [1], [0, 0, 1, 1], [], []>} : vector<2x128xbf16>, vector<128x256xbf16>, vector<2x256xf32> -> vector<2x256xf32>
    %147 = arith.addf %144, %146 : vector<2x256xf32>
    %c640 = arith.constant 640 : index
    %c0_44 = arith.constant 0 : index
    %148 = vector.load %arg1[%c640, %c0_44] : memref<1088x256xbf16, #tpu.memory_space<vmem>>, vector<64x256xbf16>
    %cst_45 = arith.constant dense<0.000000e+00> : vector<2x256xf32>
    %149 = tpu.matmul %78, %148, %cst_45 {dimension_numbers = #tpu.dot_dimension_numbers<[1], [0], [0], [1], [0, 0, 1, 1], [], []>} : vector<2x64xbf16>, vector<64x256xbf16>, vector<2x256xf32> -> vector<2x256xf32>
    %150 = arith.addf %147, %149 : vector<2x256xf32>
    %cst_46 = arith.constant dense<0.000000e+00> : vector<256xf32>
    %151 = vector.multi_reduction <add>, %150, %cst_46 [0] : vector<2x256xf32> to vector<256xf32>
    %152 = vector.shape_cast %151 : vector<256xf32> to vector<1x256xf32>
    %153 = arith.mulf %150, %150 : vector<2x256xf32>
    %cst_47 = arith.constant dense<0.000000e+00> : vector<256xf32>
    %154 = vector.multi_reduction <add>, %153, %cst_47 [0] : vector<2x256xf32> to vector<256xf32>
    %155 = vector.shape_cast %154 : vector<256xf32> to vector<1x256xf32>
    %cst_48 = arith.constant 5.000000e-01 : f32
    %156 = vector.broadcast %cst_48 : f32 to vector<1x256xf32>
    %157 = arith.mulf %152, %156 : vector<1x256xf32>
    %cst_49 = arith.constant 5.000000e-01 : f32
    %158 = vector.broadcast %cst_49 : f32 to vector<1x256xf32>
    %159 = arith.mulf %155, %158 : vector<1x256xf32>
    %160 = arith.mulf %157, %157 : vector<1x256xf32>
    %161 = arith.subf %159, %160 : vector<1x256xf32>
    %cst_50 = arith.constant 0.000000e+00 : f32
    %162 = vector.broadcast %cst_50 : f32 to vector<1x256xf32>
    %163 = arith.maximumf %161, %162 : vector<1x256xf32>
    %164 = vector.extract_strided_slice %0 {offsets = [0, 640], sizes = [1, 256], strides = [1, 1]} : vector<8x1152xf32> to vector<1x256xf32>
    %165 = vector.extract_strided_slice %0 {offsets = [1, 640], sizes = [1, 256], strides = [1, 1]} : vector<8x1152xf32> to vector<1x256xf32>
    %cst_51 = arith.constant 9.99999974E-6 : f32
    %166 = vector.broadcast %cst_51 : f32 to vector<1x256xf32>
    %167 = arith.addf %163, %166 : vector<1x256xf32>
    %168 = math.rsqrt %167 : vector<1x256xf32>
    %169 = arith.mulf %164, %168 : vector<1x256xf32>
    %170 = arith.mulf %157, %169 : vector<1x256xf32>
    %171 = arith.subf %165, %170 : vector<1x256xf32>
    %172 = vector.broadcast %169 : vector<1x256xf32> to vector<2x256xf32>
    %173 = arith.mulf %150, %172 : vector<2x256xf32>
    %174 = vector.broadcast %171 : vector<1x256xf32> to vector<2x256xf32>
    %175 = arith.addf %173, %174 : vector<2x256xf32>
    %cst_52 = arith.constant 0.000000e+00 : f32
    %176 = vector.broadcast %cst_52 : f32 to vector<2x256xf32>
    %177 = arith.maximumf %175, %176 : vector<2x256xf32>
    %178 = arith.truncf %177 : vector<2x256xf32> to vector<2x256xbf16>
    %c704 = arith.constant 704 : index
    %c0_53 = arith.constant 0 : index
    %179 = vector.load %arg1[%c704, %c0_53] : memref<1088x256xbf16, #tpu.memory_space<vmem>>, vector<256x128xbf16>
    %cst_54 = arith.constant dense<0.000000e+00> : vector<2x128xf32>
    %180 = tpu.matmul %178, %179, %cst_54 {dimension_numbers = #tpu.dot_dimension_numbers<[1], [0], [0], [1], [0, 0, 1, 1], [], []>} : vector<2x256xbf16>, vector<256x128xbf16>, vector<2x128xf32> -> vector<2x128xf32>
    %cst_55 = arith.constant dense<0.000000e+00> : vector<128xf32>
    %181 = vector.multi_reduction <add>, %180, %cst_55 [0] : vector<2x128xf32> to vector<128xf32>
    %182 = vector.shape_cast %181 : vector<128xf32> to vector<1x128xf32>
    %183 = arith.mulf %180, %180 : vector<2x128xf32>
    %cst_56 = arith.constant dense<0.000000e+00> : vector<128xf32>
    %184 = vector.multi_reduction <add>, %183, %cst_56 [0] : vector<2x128xf32> to vector<128xf32>
    %185 = vector.shape_cast %184 : vector<128xf32> to vector<1x128xf32>
    %cst_57 = arith.constant 5.000000e-01 : f32
    %186 = vector.broadcast %cst_57 : f32 to vector<1x128xf32>
    %187 = arith.mulf %182, %186 : vector<1x128xf32>
    %cst_58 = arith.constant 5.000000e-01 : f32
    %188 = vector.broadcast %cst_58 : f32 to vector<1x128xf32>
    %189 = arith.mulf %185, %188 : vector<1x128xf32>
    %190 = arith.mulf %187, %187 : vector<1x128xf32>
    %191 = arith.subf %189, %190 : vector<1x128xf32>
    %cst_59 = arith.constant 0.000000e+00 : f32
    %192 = vector.broadcast %cst_59 : f32 to vector<1x128xf32>
    %193 = arith.maximumf %191, %192 : vector<1x128xf32>
    %194 = vector.extract_strided_slice %0 {offsets = [0, 896], sizes = [1, 128], strides = [1, 1]} : vector<8x1152xf32> to vector<1x128xf32>
    %195 = vector.extract_strided_slice %0 {offsets = [1, 896], sizes = [1, 128], strides = [1, 1]} : vector<8x1152xf32> to vector<1x128xf32>
    %cst_60 = arith.constant 9.99999974E-6 : f32
    %196 = vector.broadcast %cst_60 : f32 to vector<1x128xf32>
    %197 = arith.addf %193, %196 : vector<1x128xf32>
    %198 = math.rsqrt %197 : vector<1x128xf32>
    %199 = arith.mulf %194, %198 : vector<1x128xf32>
    %200 = arith.mulf %187, %199 : vector<1x128xf32>
    %201 = arith.subf %195, %200 : vector<1x128xf32>
    %202 = vector.broadcast %199 : vector<1x128xf32> to vector<2x128xf32>
    %203 = arith.mulf %180, %202 : vector<2x128xf32>
    %204 = vector.broadcast %201 : vector<1x128xf32> to vector<2x128xf32>
    %205 = arith.addf %203, %204 : vector<2x128xf32>
    %cst_61 = arith.constant 0.000000e+00 : f32
    %206 = vector.broadcast %cst_61 : f32 to vector<2x128xf32>
    %207 = arith.maximumf %205, %206 : vector<2x128xf32>
    %208 = arith.truncf %207 : vector<2x128xf32> to vector<2x128xbf16>
    %c960 = arith.constant 960 : index
    %c0_62 = arith.constant 0 : index
    %209 = vector.load %arg1[%c960, %c0_62] : memref<1088x256xbf16, #tpu.memory_space<vmem>>, vector<128x16xbf16>
    %cst_63 = arith.constant dense<0.000000e+00> : vector<2x16xf32>
    %210 = tpu.matmul %208, %209, %cst_63 {dimension_numbers = #tpu.dot_dimension_numbers<[1], [0], [0], [1], [0, 0, 1, 1], [], []>} : vector<2x128xbf16>, vector<128x16xbf16>, vector<2x16xf32> -> vector<2x16xf32>
    %cst_64 = arith.constant dense<0.000000e+00> : vector<16xf32>
    %211 = vector.multi_reduction <add>, %210, %cst_64 [0] : vector<2x16xf32> to vector<16xf32>
    %212 = vector.shape_cast %211 : vector<16xf32> to vector<1x16xf32>
    %213 = arith.mulf %210, %210 : vector<2x16xf32>
    %cst_65 = arith.constant dense<0.000000e+00> : vector<16xf32>
    %214 = vector.multi_reduction <add>, %213, %cst_65 [0] : vector<2x16xf32> to vector<16xf32>
    %215 = vector.shape_cast %214 : vector<16xf32> to vector<1x16xf32>
    %cst_66 = arith.constant 5.000000e-01 : f32
    %216 = vector.broadcast %cst_66 : f32 to vector<1x16xf32>
    %217 = arith.mulf %212, %216 : vector<1x16xf32>
    %cst_67 = arith.constant 5.000000e-01 : f32
    %218 = vector.broadcast %cst_67 : f32 to vector<1x16xf32>
    %219 = arith.mulf %215, %218 : vector<1x16xf32>
    %220 = arith.mulf %217, %217 : vector<1x16xf32>
    %221 = arith.subf %219, %220 : vector<1x16xf32>
    %cst_68 = arith.constant 0.000000e+00 : f32
    %222 = vector.broadcast %cst_68 : f32 to vector<1x16xf32>
    %223 = arith.maximumf %221, %222 : vector<1x16xf32>
    %224 = vector.extract_strided_slice %0 {offsets = [0, 1024], sizes = [1, 16], strides = [1, 1]} : vector<8x1152xf32> to vector<1x16xf32>
    %225 = vector.extract_strided_slice %0 {offsets = [1, 1024], sizes = [1, 16], strides = [1, 1]} : vector<8x1152xf32> to vector<1x16xf32>
    %cst_69 = arith.constant 9.99999974E-6 : f32
    %226 = vector.broadcast %cst_69 : f32 to vector<1x16xf32>
    %227 = arith.addf %223, %226 : vector<1x16xf32>
    %228 = math.rsqrt %227 : vector<1x16xf32>
    %229 = arith.mulf %224, %228 : vector<1x16xf32>
    %230 = arith.mulf %217, %229 : vector<1x16xf32>
    %231 = arith.subf %225, %230 : vector<1x16xf32>
    %232 = vector.broadcast %229 : vector<1x16xf32> to vector<2x16xf32>
    %233 = arith.mulf %210, %232 : vector<2x16xf32>
    %234 = vector.broadcast %231 : vector<1x16xf32> to vector<2x16xf32>
    %235 = arith.addf %233, %234 : vector<2x16xf32>
    %cst_70 = arith.constant 0.000000e+00 : f32
    %236 = vector.broadcast %cst_70 : f32 to vector<2x16xf32>
    %237 = arith.maximumf %235, %236 : vector<2x16xf32>
    %238 = arith.truncf %237 : vector<2x16xf32> to vector<2x16xbf16>
    %239 = vector.extract_strided_slice %0 {offsets = [5, 0], sizes = [1, 16], strides = [1, 1]} : vector<8x1152xf32> to vector<1x16xf32>
    %240 = vector.extract_strided_slice %0 {offsets = [6, 0], sizes = [1, 1], strides = [1, 1]} : vector<8x1152xf32> to vector<1x1xf32>
    %241 = arith.extf %238 : vector<2x16xbf16> to vector<2x16xf32>
    %242 = vector.broadcast %239 : vector<1x16xf32> to vector<2x16xf32>
    %243 = arith.mulf %241, %242 : vector<2x16xf32>
    %cst_71 = arith.constant dense<0.000000e+00> : vector<2xf32>
    %244 = vector.multi_reduction <add>, %243, %cst_71 [1] : vector<2x16xf32> to vector<2xf32>
    %245 = vector.shape_cast %244 : vector<2xf32> to vector<2x1xf32>
    %246 = vector.broadcast %240 : vector<1x1xf32> to vector<2x1xf32>
    %247 = arith.addf %245, %246 : vector<2x1xf32>
    %c0_72 = arith.constant 0 : index
    %c0_73 = arith.constant 0 : index
    %248 = vector.load %arg3[%c0_72, %c0_73] : memref<2x1xf32, #tpu.memory_space<vmem>>, vector<2x1xf32>
    tpu.vector_store %arg3[%c0_72, %c0_73], %247 {strides = array<i32>} : memref<2x1xf32, #tpu.memory_space<vmem>>, vector<2x1xf32>,
    return
  }
}

</mosaic_0001>

<bundles_post_ra>
// kernel: tpu_custom_call.1
= control target key start
LH: loop header
LB: loop body
LE: loop exit
PB: predicated region body
PF: predicated region fallthrough
CT: control target
= control target key end

     0   :  { %8 = vsyncpa [#allocation3], 0  ;;  %s2291_s0 = inlined_call_operand.vmem [shape: f32[16,3], index: 0, kind: input, shape index: {}]   ;;  %s2292_s1 = inlined_call_operand.hbm [shape: bf16[1088,256], index: 1, kind: input, shape index: {}]   ;;  %s2293_s2 = inlined_call_operand.hbm [shape: f32[8,1152], index: 2, kind: input, shape index: {}]   ;;  %s2294_s3 = inlined_call_operand.vmem [shape: f32[2,1], index: 3, kind: output, shape index: {}]  }
   0x1   :  { %9 = vsyncpa [#allocation5], 0  ;;  %s2132_s12 = smov [#allocation2]   ;;  %s2084_s16 = scalar_lea.hbm %s2292_s1, 17408 }
   0x2   :  { %s17_s13 = sshll.u32 %s2132_s12, 4  ;;  %p2085_p0 = scmp.ne.s32.totalorder %s2292_s1, %s2084_s16  ;;  %s18_s13 = int_to_ptr.vmem [resolvable:$true] %s17_s13 }
   0x3   :  { %p2088_p1 = scmp.lt.u32.totalorder %s2084_s16, %s2292_s1 }
   0x5   :  { %p2090_p2 = pnand %p2088_p1, %p2085_p0 }
   0x7   :  { %2093 = shalt.err (!%p2090_p2)
}
   0x8   :  { %s2094_s21 = scalar_lea.vmem %s18_s13, 17408  ;;  %p2099_p4 = scmp.lt.s32.totalorder %s18_s13, %s18_s13 }
   0x9   :  { %p2095_p3 = scmp.ne.s32.totalorder %s18_s13, %s2094_s21  ;;  %p2100_p5 = scmp.lt.s32.totalorder %s2094_s21, %s2094_s21 }
   0xb   :  { %p2101_p6 = por %p2100_p5, %p2099_p4 }
   0xd   :  { %p2102_p7 = pnand %p2101_p6, %p2095_p3 }
   0xf   :  { %2105 = shalt.err (!%p2102_p7)
}
  0x10   :  { %s2133_s22 = smov 128   ;;  %s2134_s23 = smov 8  }
  0x11   :  { %23 = dma.hbm_to_vmem [thread:$0]  %s2292_s1, 17408, %s18_s13, [#allocation3], %s2133_s22, %s2133_s22, %s2134_s23  }
  0x12   :  { %s2135_s26 = smov [#allocation4]   ;;  %s2106_s30 = scalar_lea.hbm %s2293_s2, 1152 }
  0x13   :  { %s30_s27 = sshll.u32 %s2135_s26, 4  ;;  %p2107_p8 = scmp.ne.s32.totalorder %s2293_s2, %s2106_s30  ;;  %s31_s27 = int_to_ptr.vmem [resolvable:$true] %s30_s27 }
  0x14   :  { %p2110_p9 = scmp.lt.u32.totalorder %s2106_s30, %s2293_s2 }
  0x16   :  { %p2112_p10 = pnand %p2110_p9, %p2107_p8 }
  0x18   :  { %2115 = shalt.err (!%p2112_p10)
}
  0x19   :  { %s2116_s8 = scalar_lea.vmem %s31_s27, 1152  ;;  %p2121_p12 = scmp.lt.s32.totalorder %s31_s27, %s31_s27 }
  0x1a   :  { %p2117_p11 = scmp.ne.s32.totalorder %s31_s27, %s2116_s8  ;;  %p2122_p13 = scmp.lt.s32.totalorder %s2116_s8, %s2116_s8 }
  0x1c   :  { %p2123_p0 = por %p2122_p13, %p2121_p12 }
  0x1e   :  { %p2124_p1 = pnand %p2123_p0, %p2117_p11 }
  0x20   :  { %2127 = shalt.err (!%p2124_p1)
}
  0x21   :  { %33 = dma.hbm_to_vmem [thread:$0]  %s2293_s2, 1152, %s31_s27, [#allocation5]  }
  0x22   :  { %2128 = dma.done.wait [#allocation3], 17408  }
  0x23   :  { %2129 = vsyncadd [#allocation3], 4294949888 }
  0x24   :  { %2130 = dma.done.wait [#allocation5], 1152  }
  0x25   :  { %2131 = vsyncadd [#allocation5], 4294966144  ;;  %v2136_v0 = vmov 1   ;;  %v2137_v1 = vmov 0   ;;  %v51_v2 = vld [vmem:[%s2291_s0] sm:$0xff]  ;;  %v52_v3 = vld [vmem:[%s2291_s0 + $0x8] sm:$0xff]  ;;  %v63_v10 = vlaneseq }
  0x26   :  { %1922 = vset.pattern.permute.xlu1 %v2136_v0  ;;  %1921 = vset.pattern.permute.xlu0 %v2137_v1  ;;  %v2138_v4 = vmov 2   ;;  %v1925_v5 = vld [vmem:[#allocation2] ss:$8 sps:$4 sm:$0xff]   ;;  %v2139_v6 = vmov 0.0   ;;  %v1926_v7 = vld [vmem:[#allocation2 + $0x10] ss:$8 sps:$4 sm:$0xff]  }
  0x27   :  { %70 = vperm.xlu1 %1922, %v51_v2   ;;  %55 = vperm.xlu0 %1921, %v51_v2   ;;  %v1927_v8 = vld [vmem:[#allocation2 + $0x20] ss:$8 sps:$4 sm:$0xff]   ;;  %v1928_v9 = vld [vmem:[#allocation2 + $0x30] ss:$8 sps:$4 sm:$0xff]   ;;  %vm2140_vm0 = vmmov 0   ;;  %v2201_v11 = vshrl.u32 %v63_v10, 7 }
  0x28   :  { %1860 = vmatprep.subr.bf16.mxu0 %v2139_v6  ;;  %1872 = vmatprep.subr.bf16.mxu1 %v2139_v6  ;;  %v42_v14 = vld [vmem:[#allocation4] sm:$0xff]  ;;  %vm101_vm1 = vcmask 523264   ;;  %vm279_vm2 = vcmask 519168   ;;  %vm800_vm3 = vcmask 1041409   ;;  %vm432_vm4 = vcmask 1043456  }
  0x29   :  { %1861 = vmatpush3.bf16.msra.mxu0 %v1925_v5  ;;  %1868 = vmatprep.mubr.msk.bf16.mxu0 %vm2140_vm0, %v2139_v6  ;;  %v79_v12 = vsub.s32 3, %v2201_v11  ;;  %v65_v13 = vsub.s32 2, %v2201_v11  ;;  %v95_v17 = vsub.s32 4, %v2201_v11  ;;  %v2211_v62 = vsub.s32 0, %v2201_v11 }
  0x2a   :  { %1862 = vmatprep.subr.bf16.mxu0 %v2139_v6  ;;  %1880 = vmatprep.mubr.msk.bf16.mxu1 %vm2140_vm0, %v2139_v6  ;;  %vm1240_vm5 = vcmask 1041408   ;;  %vm1633_vm6 = vcmask 123904   ;;  %vm1688_vm7 = vcmask 1024  }
  0x2b   :  { %74 = vperm.xlu1 %1922, %v52_v3   ;;  %60 = vperm.xlu0 %1921, %v52_v3   ;;  %v80_v18 = vrot.slane %v42_v14, %v79_v12  ;;  %v66_v19 = vrot.slane %v42_v14, %v65_v13  ;;  %v96_v22 = vrot.slane %v42_v14, %v95_v17  ;;  %v1929_v17 = vld [vmem:[#allocation2 + $0x40] ss:$8 sps:$4 sm:$0xff]  }
  0x2c   :  { %1873 = vmatpush3.bf16.msra.mxu1 %v1929_v17 }
  0x2d   :  { %1863 = vmatpush3.bf16.msra.mxu0 %v1926_v7  ;;  %1874 = vmatprep.subr.bf16.mxu1 %v2139_v6 }
  0x2e   :  { %1864 = vmatprep.subr.bf16.mxu0 %v2139_v6 }
  0x2f   :  { %1924 = vset.pattern.permute.xlu1 %v2138_v4  ;;  %1923 = vset.pattern.permute.xlu0 %v2138_v4 }
  0x30   :  { %90 = vperm.xlu1 %1924, %v52_v3   ;;  %86 = vperm.xlu0 %1923, %v51_v2   ;;  %v2214_v2 = vsub.s32 1, %v2201_v11 }
  0x31   :  { %1865 = vmatpush3.bf16.msra.mxu0 %v1927_v8 }
  0x32   :  { %1866 = vmatprep.subr.bf16.mxu0 %v2139_v6 }
  0x35   :  { %1867 = vmatpush3.bf16.msra.mxu0 %v1928_v9 }
  0xa6   :  { %v71_v15 = vpop.permute.xlu1 %70  ;;  %v56_v16 = vpop.permute.xlu0 %55 }
  0xa7   :  { %v81_v23 = vmul.f32 %v80_v18, %v71_v15  ;;  %v67_v24 = vmul.f32 %v66_v19, %v56_v16 }
  0xa9   :  { %v83_v29 = vadd.f32 %v81_v23, %v67_v24 }
  0xaa   :  { %v75_v20 = vpop.permute.xlu1 %74  ;;  %v61_v21 = vpop.permute.xlu0 %60 }
  0xab   :  { %v82_v25 = vmul.f32 %v80_v18, %v75_v20  ;;  %v68_v26 = vmul.f32 %v66_v19, %v61_v21  ;;  %v1930_v18 = vld [vmem:[#allocation2 + $0x50] ss:$8 sps:$4 sm:$0xff]  }
  0xac   :  { %1875 = vmatpush3.bf16.msra.mxu1 %v1930_v18  ;;  %v1932_v19 = vld [vmem:[#allocation2 + $0x70] ss:$8 sps:$4 sm:$0xff]  }
  0xad   :  { %v84_v30 = vadd.f32 %v82_v25, %v68_v26  ;;  %1876 = vmatprep.subr.bf16.mxu1 %v2139_v6 }
  0xaf   :  { %v91_v27 = vpop.permute.xlu1 %90  ;;  %v87_v28 = vpop.permute.xlu0 %86 }
  0xb0   :  { %v98_v31 = vmul.f32 %v96_v22, %v91_v27  ;;  %v97_v32 = vmul.f32 %v96_v22, %v87_v28 }
  0xb2   :  { %v100_v33 = vadd.f32 %v98_v31, %v84_v30  ;;  %v99_v34 = vadd.f32 %v97_v32, %v83_v29 }
  0xb4   :  { %v103_v35 = vsel %vm101_vm1, %v100_v33, 0.0  ;;  %v112_v36 = vmul.f32 %v100_v33, %v100_v33  ;;  %v102_v37 = vsel %vm101_vm1, %v99_v34, 0.0  ;;  %v111_v38 = vmul.f32 %v99_v34, %v99_v34 }
  0xb5   :  { %v104_v39 = vadd.f32 %v103_v35, %v102_v37 }
  0xb6   :  { %v114_v40 = vsel %vm101_vm1, %v112_v36, 0.0  ;;  %v113_v41 = vsel %vm101_vm1, %v111_v38, 0.0 }
  0xb7   :  { %v105_v42 = vrot.slane %v104_v39, 4  ;;  %v115_v43 = vadd.f32 %v114_v40, %v113_v41 }
  0xb9   :  { %v106_v44 = vadd.f32 %v105_v42, %v104_v39  ;;  %v116_v45 = vrot.slane %v115_v43, 4 }
  0xbb   :  { %v107_v46 = vrot.slane %v106_v44, 2  ;;  %v117_v47 = vadd.f32 %v116_v45, %v115_v43 }
  0xbd   :  { %v108_v48 = vadd.f32 %v107_v46, %v106_v44  ;;  %v118_v49 = vrot.slane %v117_v47, 2 }
  0xbf   :  { %v109_v50 = vrot.slane %v108_v48, 1  ;;  %v119_v51 = vadd.f32 %v118_v49, %v117_v47 }
  0xc1   :  { %v110_v52 = vadd.f32 %v109_v50, %v108_v48  ;;  %v120_v53 = vrot.slane %v119_v51, 1  ;;  %v43_v50 = vld [vmem:[#allocation4 + $0x8] sm:$0xff] }
  0xc3   :  { %v121_v54 = vadd.f32 %v120_v53, %v119_v51  ;;  %v122_v55 = vmul.f32 0.0625, %v110_v52 }
  0xc5   :  { %v123_v56 = vmul.f32 0.0625, %v121_v54  ;;  %v124_v57 = vmul.f32 %v122_v55, %v122_v55 }
  0xc7   :  { %v125_v58 = vsub.f32 %v123_v56, %v124_v57 }
  0xc9   :  { %v126_v59 = vmax.f32 %v125_v58, 0.0 }
  0xcb   :  { %v127_v60 = vadd.f32 1e-05, %v126_v59 }
  0xcd   :  { %2065 = vrsqrt.f32 %v127_v60 }
  0xd7   :  { %v2066_v61 = vpop.eup %2065 }
  0xd8   :  { %v129_v63 = vmul.f32 %v2066_v61, %v42_v14 }
  0xda   :  { %v130_v0 = vmul.f32 %v129_v63, %v122_v55  ;;  %v138_v4 = vrot.slane %v129_v63, %v2211_v62 }
  0xdc   :  { %v132_v3 = vrot.slane %v130_v0, 7  ;;  %v139_v7 = vmul.f32 %v138_v4, %v99_v34  ;;  %v140_v8 = vmul.f32 %v138_v4, %v100_v33 }
  0xde   :  { %v134_v5 = vsub.f32 %v42_v14, %v132_v3  ;;  %v1931_v14 = vld [vmem:[#allocation2 + $0x60] ss:$8 sps:$4 sm:$0xff]  }
  0xdf   :  { %1877 = vmatpush3.bf16.msra.mxu1 %v1931_v14 }
  0xe0   :  { %v144_v9 = vrot.slane %v134_v5, %v2214_v2  ;;  %1878 = vmatprep.subr.bf16.mxu1 %v2139_v6 }
  0xe2   :  { %v145_v10 = vadd.f32 %v144_v9, %v139_v7  ;;  %v146_v12 = vadd.f32 %v144_v9, %v140_v8 }
  0xe3   :  { %1879 = vmatpush3.bf16.msra.mxu1 %v1932_v19 }
  0xe4   :  { %v147_v13 = vmax.f32 %v145_v10, 0.0  ;;  %v148_v15 = vmax.f32 %v146_v12, 0.0 }
  0xe6   :  { %v149_v16 = vpack.c.bf16 %v148_v15, %v147_v13 }
  0xe8   :  { %1869 = vmatmul.mubr.msk.bf16.vlgmr.msra.gmra.mrb[0].mxu0 %vm101_vm1, %v149_v16 }
  0xe9   :  { %587 = vmatprep.mubr.bf16.mxu0 %v2137_v1 }
 0x1bb   :  { %v219_v20 = vpop.f32.mrb[0].mxu0 }
 0x1bc   :  { %v235_v21 = vmul.f32 %v219_v20, %v219_v20  ;;  %v1870_v22 = vpop.f32.mrb[1].mxu0  ;;  %v226_v24 = vsel %vm101_vm1, %v219_v20, 0.0 }
 0x1bd   :  { %v222_v23 = vpop.f32.mrb[2].mxu0 }
 0x1be   :  { %v227_v25 = vsel %vm101_vm1, %v222_v23, 0.0  ;;  %v236_v26 = vmul.f32 %v222_v23, %v222_v23  ;;  %v1871_v27 = vpop.f32.mrb[3].mxu0  ;;  %v237_v29 = vsel %vm101_vm1, %v235_v21, 0.0 }
 0x1bf   :  { %v228_v28 = vadd.f32 %v227_v25, %v226_v24 }
 0x1c0   :  { %v238_v30 = vsel %vm101_vm1, %v236_v26, 0.0 }
 0x1c1   :  { %v229_v31 = vrot.slane %v228_v28, 4  ;;  %v239_v32 = vadd.f32 %v238_v30, %v237_v29 }
 0x1c3   :  { %v230_v33 = vadd.f32 %v229_v31, %v228_v28  ;;  %v240_v34 = vrot.slane %v239_v32, 4 }
 0x1c5   :  { %v231_v35 = vrot.slane %v230_v33, 2  ;;  %v241_v36 = vadd.f32 %v240_v34, %v239_v32  ;;  %v1933_v34 = vld [vmem:[#allocation2 + $0x80] ss:$8 sps:$4 sm:$0xff]  }
 0x1c7   :  { %v232_v37 = vadd.f32 %v231_v35, %v230_v33  ;;  %v242_v38 = vrot.slane %v241_v36, 2  ;;  %v1935_v33 = vld [vmem:[#allocation2 + $0x84] ss:$8 sps:$4 sm:$0xff]   ;;  %v1938_v35 = vld [vmem:[#allocation2 + $0x94] ss:$8 sps:$4 sm:$0xff]  }
 0x1c8   :  { %555 = vmatprep.subr.bf16.mxu0 %v1935_v33  ;;  %v44_v33 = vld [vmem:[#allocation4 + $0x10] sm:$0xff] }
 0x1c9   :  { %v233_v39 = vrot.slane %v232_v37, 1  ;;  %v243_v40 = vadd.f32 %v242_v38, %v241_v36  ;;  %556 = vmatpush1.bf16.msra.mxu0 %v1933_v34  ;;  %v1936_v36 = vld [vmem:[#allocation2 + $0x90] ss:$8 sps:$4 sm:$0xff]   ;;  %v1939_v38 = vld [vmem:[#allocation2 + $0xa0] ss:$8 sps:$4 sm:$0xff]  }
 0x1ca   :  { %557 = vmatprep.subr.bf16.mxu0 %v1938_v35 }
 0x1cb   :  { %v234_v41 = vadd.f32 %v233_v39, %v232_v37  ;;  %v244_v42 = vrot.slane %v243_v40, 1  ;;  %v1941_v37 = vld [vmem:[#allocation2 + $0xa4] ss:$8 sps:$4 sm:$0xff]   ;;  %v1944_v39 = vld [vmem:[#allocation2 + $0xb4] ss:$8 sps:$4 sm:$0xff]  }
 0x1cd   :  { %v245_v43 = vadd.f32 %v244_v42, %v243_v40  ;;  %v246_v44 = vmul.f32 0.0625, %v234_v41  ;;  %558 = vmatpush1.bf16.msra.mxu0 %v1936_v36  ;;  %v1942_v40 = vld [vmem:[#allocation2 + $0xb0] ss:$8 sps:$4 sm:$0xff]   ;;  %v1947_v41 = vld [vmem:[#allocation2 + $0xc4] ss:$8 sps:$4 sm:$0xff]  }
 0x1ce   :  { %559 = vmatprep.subr.bf16.mxu0 %v1941_v37  ;;  %v1945_v42 = vld [vmem:[#allocation2 + $0xc0] ss:$8 sps:$4 sm:$0xff]  }
 0x1cf   :  { %v247_v45 = vmul.f32 0.0625, %v245_v43  ;;  %v248_v46 = vmul.f32 %v246_v44, %v246_v44  ;;  %v1950_v43 = vld [vmem:[#allocation2 + $0xd4] ss:$8 sps:$4 sm:$0xff]  }
 0x1d1   :  { %v249_v47 = vsub.f32 %v247_v45, %v248_v46  ;;  %560 = vmatpush1.bf16.msra.mxu0 %v1939_v38  ;;  %v1953_v45 = vld [vmem:[#allocation2 + $0xe4] ss:$8 sps:$4 sm:$0xff]  }
 0x1d2   :  { %561 = vmatprep.subr.bf16.mxu0 %v1944_v39  ;;  %v1956_v46 = vld [vmem:[#allocation2 + $0x204] ss:$8 sps:$4 sm:$0xff]  }
 0x1d3   :  { %v250_v48 = vmax.f32 %v249_v47, 0.0  ;;  %v1951_v47 = vld [vmem:[#allocation2 + $0xe0] ss:$8 sps:$4 sm:$0xff]   ;;  %884 = vmatprep.subr.bf16.mxu1 %v1956_v46 }
 0x1d5   :  { %v251_v49 = vadd.f32 1e-05, %v250_v48  ;;  %562 = vmatpush1.bf16.msra.mxu0 %v1942_v40  ;;  %v1954_v48 = vld [vmem:[#allocation2 + $0x200] ss:$8 sps:$4 sm:$0xff]  }
 0x1d6   :  { %563 = vmatprep.subr.bf16.mxu0 %v1947_v41 }
 0x1d7   :  { %2067 = vrsqrt.f32 %v251_v49  ;;  %v1959_v49 = vld [vmem:[#allocation2 + $0xf4] ss:$8 sps:$4 sm:$0xff]  }
 0x1d9   :  { %564 = vmatpush1.bf16.msra.mxu0 %v1945_v42 }
 0x1da   :  { %565 = vmatprep.subr.bf16.mxu0 %v1950_v43 }
 0x1e1   :  { %v2068_v51 = vpop.eup %2067 }
 0x1e2   :  { %v253_v52 = vmul.f32 %v2068_v51, %v43_v50  ;;  %v1957_v51 = vld [vmem:[#allocation2 + $0xf0] ss:$8 sps:$4 sm:$0xff]  }
 0x1e4   :  { %v254_v53 = vmul.f32 %v253_v52, %v246_v44  ;;  %v262_v54 = vrot.slane %v253_v52, %v2211_v62  ;;  %v1948_v44 = vld [vmem:[#allocation2 + $0xd0] ss:$8 sps:$4 sm:$0xff]  }
 0x1e5   :  { %566 = vmatpush1.bf16.msra.mxu0 %v1948_v44  ;;  %v1960_v52 = vld [vmem:[#allocation2 + $0x210] ss:$8 sps:$4 sm:$0xff]  }
 0x1e6   :  { %v256_v55 = vrot.slane %v254_v53, 7  ;;  %v263_v56 = vmul.f32 %v262_v54, %v219_v20  ;;  %v264_v57 = vmul.f32 %v262_v54, %v222_v23  ;;  %567 = vmatprep.subr.bf16.mxu0 %v1953_v45  ;;  %v1965_v53 = vld [vmem:[#allocation2 + $0x224] ss:$8 sps:$4 sm:$0xff]   ;;  %v1963_v54 = vld [vmem:[#allocation2 + $0x220] ss:$8 sps:$4 sm:$0xff]  }
 0x1e8   :  { %v258_v58 = vsub.f32 %v43_v50, %v256_v55  ;;  %v1962_v50 = vld [vmem:[#allocation2 + $0x214] ss:$8 sps:$4 sm:$0xff]  }
 0x1e9   :  { %568 = vmatpush1.bf16.msra.mxu0 %v1951_v47  ;;  %v1968_v55 = vld [vmem:[#allocation2 + $0x234] ss:$8 sps:$4 sm:$0xff]  }
 0x1ea   :  { %v268_v59 = vrot.slane %v258_v58, %v2214_v2  ;;  %569 = vmatprep.subr.bf16.mxu0 %v1959_v49  ;;  %v1969_v58 = vld [vmem:[#allocation2 + $0x240] ss:$8 sps:$4 sm:$0xff]  }
 0x1ec   :  { %v269_v60 = vadd.f32 %v268_v59, %v263_v56  ;;  %v270_v61 = vadd.f32 %v268_v59, %v264_v57  ;;  %v1966_v56 = vld [vmem:[#allocation2 + $0x230] ss:$8 sps:$4 sm:$0xff]   ;;  %v1971_v57 = vld [vmem:[#allocation2 + $0x244] ss:$8 sps:$4 sm:$0xff]  }
 0x1ed   :  { %570 = vmatpush1.bf16.msra.mxu0 %v1957_v51  ;;  %v1972_v59 = vld [vmem:[#allocation2 + $0x250] ss:$8 sps:$4 sm:$0xff]  }
 0x1ee   :  { %v272_v63 = vmax.f32 %v270_v61, 0.0  ;;  %v271_v0 = vmax.f32 %v269_v60, 0.0  ;;  %v1974_v60 = vld [vmem:[#allocation2 + $0x254] ss:$8 sps:$4 sm:$0xff]   ;;  %v1977_v61 = vld [vmem:[#allocation2 + $0x264] ss:$8 sps:$4 sm:$0xff]  }
 0x1f0   :  { %v1812_v3 = vpack.c.bf16 %v272_v63, %v272_v63  ;;  %v273_v4 = vpack.c.bf16 %v272_v63, %v271_v0  ;;  %v1811_v5 = vpack.c.bf16 %v271_v0, %v271_v0  ;;  %v1975_v63 = vld [vmem:[#allocation2 + $0x260] ss:$8 sps:$4 sm:$0xff]   ;;  %v1980_v0 = vld [vmem:[#allocation2 + $0x274] ss:$8 sps:$4 sm:$0xff]  }
 0x1f2   :  { %v295_v7 = vsel %vm279_vm2, %v1812_v3, 4286644096  ;;  %v282_v8 = vsel %vm279_vm2, %v1811_v5, 4286644096  ;;  %1881 = vmatmul.mubr.msk.bf16.vlgmr.msra.gmra.mrb[0].mxu1 %vm101_vm1, %v273_v4  ;;  %v1978_v3 = vld [vmem:[#allocation2 + $0x270] ss:$8 sps:$4 sm:$0xff]  }
 0x1f3   :  { %v297_v9 = vunpack.i.l.bf16 %v295_v7  ;;  %v298_v10 = vunpack.i.h.bf16 %v295_v7  ;;  %v284_v12 = vunpack.i.l.bf16 %v282_v8  ;;  %v285_v13 = vunpack.i.h.bf16 %v282_v8  ;;  %916 = vmatprep.mubr.bf16.mxu1 %v2137_v1  ;;  %885 = vmatpush1.bf16.msra.mxu1 %v1954_v48 }
 0x1f4   :  { %886 = vmatprep.subr.bf16.mxu1 %v1962_v50 }
 0x1f5   :  { %v299_v15 = vmax.f32 %v297_v9, %v298_v10  ;;  %v286_v16 = vmax.f32 %v284_v12, %v285_v13 }
 0x1f7   :  { %v300_v17 = vrot.slane %v299_v15, 4  ;;  %v287_v18 = vrot.slane %v286_v16, 4  ;;  %887 = vmatpush1.bf16.msra.mxu1 %v1960_v52 }
 0x1f8   :  { %888 = vmatprep.subr.bf16.mxu1 %v1965_v53 }
 0x1f9   :  { %v301_v14 = vmax.f32 %v299_v15, %v300_v17  ;;  %v288_v19 = vmax.f32 %v286_v16, %v287_v18 }
 0x1fb   :  { %v302_v20 = vrot.slane %v301_v14, 2  ;;  %v289_v21 = vrot.slane %v288_v19, 2  ;;  %889 = vmatpush1.bf16.msra.mxu1 %v1963_v54 }
 0x1fc   :  { %890 = vmatprep.subr.bf16.mxu1 %v1968_v55 }
 0x1fd   :  { %v303_v22 = vmax.f32 %v301_v14, %v302_v20  ;;  %v290_v23 = vmax.f32 %v288_v19, %v289_v21 }
 0x1ff   :  { %v304_v24 = vrot.slane %v303_v22, 1  ;;  %v291_v25 = vrot.slane %v290_v23, 1  ;;  %891 = vmatpush1.bf16.msra.mxu1 %v1966_v56 }
 0x200   :  { %892 = vmatprep.subr.bf16.mxu1 %v1971_v57 }
 0x201   :  { %v292_v26 = vmax.f32 %v290_v23, %v291_v25  ;;  %v305_v27 = vmax.f32 %v303_v22, %v304_v24 }
 0x203   :  { %v293_v28 = vpack.i.bf16 %v292_v26, %v292_v26  ;;  %v306_v29 = vpack.i.bf16 %v305_v27, %v305_v27  ;;  %893 = vmatpush1.bf16.msra.mxu1 %v1969_v58 }
 0x204   :  { %894 = vmatprep.subr.bf16.mxu1 %v1974_v60 }
 0x205   :  { %v1150_v30 = vunpack.c.l.b16 %v293_v28  ;;  %v1151_v31 = vunpack.c.l.b16 %v306_v29 }
 0x207   :  { %v2232_v32 = vsel %vm800_vm3, %v1151_v31, %v1150_v30  ;;  %895 = vmatpush1.bf16.msra.mxu1 %v1972_v59 }
 0x208   :  { %896 = vmatprep.subr.bf16.mxu1 %v1977_v61 }
 0x20b   :  { %897 = vmatpush1.bf16.msra.mxu1 %v1975_v63 }
 0x20c   :  { %898 = vmatprep.subr.bf16.mxu1 %v1980_v0 }
 0x20f   :  { %899 = vmatpush1.bf16.msra.mxu1 %v1978_v3 }
 0x2c5   :  { %v376_v4 = vpop.f32.mrb[0].mxu1 }
 0x2c6   :  { %v1882_v5 = vpop.f32.mrb[1].mxu1  ;;  %v390_v8 = vmul.f32 %v376_v4, %v376_v4 }
 0x2c7   :  { %v379_v7 = vpop.f32.mrb[2].mxu1 }
 0x2c8   :  { %v383_v9 = vadd.f32 %v379_v7, %v376_v4  ;;  %v391_v10 = vmul.f32 %v379_v7, %v379_v7  ;;  %v1883_v12 = vpop.f32.mrb[3].mxu1 }
 0x2ca   :  { %v384_v13 = vrot.slane %v383_v9, 4  ;;  %v392_v15 = vadd.f32 %v391_v10, %v390_v8 }
 0x2cc   :  { %v385_v16 = vadd.f32 %v384_v13, %v383_v9  ;;  %v393_v17 = vrot.slane %v392_v15, 4 }
 0x2ce   :  { %v386_v18 = vrot.slane %v385_v16, 2  ;;  %v394_v14 = vadd.f32 %v393_v17, %v392_v15 }
 0x2d0   :  { %v387_v19 = vadd.f32 %v386_v18, %v385_v16  ;;  %v395_v20 = vrot.slane %v394_v14, 2  ;;  %v1983_v18 = vld [vmem:[#allocation2 + $0x104] ss:$8 sps:$4 sm:$0xff]  }
 0x2d1   :  { %1099 = vmatprep.subr.bf16.mxu1 %v1983_v18 }
 0x2d2   :  { %v388_v21 = vrot.slane %v387_v19, 1  ;;  %v396_v22 = vadd.f32 %v395_v20, %v394_v14  ;;  %v1981_v14 = vld [vmem:[#allocation2 + $0x100] ss:$8 sps:$4 sm:$0xff]   ;;  %v1984_v20 = vld [vmem:[#allocation2 + $0x110] ss:$8 sps:$4 sm:$0xff]  }
 0x2d4   :  { %v389_v23 = vadd.f32 %v388_v21, %v387_v19  ;;  %v397_v24 = vrot.slane %v396_v22, 1  ;;  %v1986_v19 = vld [vmem:[#allocation2 + $0x114] ss:$8 sps:$4 sm:$0xff]   ;;  %v1989_v21 = vld [vmem:[#allocation2 + $0x124] ss:$8 sps:$4 sm:$0xff]  }
 0x2d6   :  { %v398_v25 = vadd.f32 %v397_v24, %v396_v22  ;;  %v399_v26 = vmul.f32 0.0625, %v389_v23  ;;  %v1987_v22 = vld [vmem:[#allocation2 + $0x120] ss:$8 sps:$4 sm:$0xff]   ;;  %v1992_v23 = vld [vmem:[#allocation2 + $0x134] ss:$8 sps:$4 sm:$0xff]  }
 0x2d7   :  { %v1990_v24 = vld [vmem:[#allocation2 + $0x130] ss:$8 sps:$4 sm:$0xff]  }
 0x2d8   :  { %v400_v27 = vmul.f32 0.0625, %v398_v25  ;;  %v401_v28 = vmul.f32 %v399_v26, %v399_v26  ;;  %v1995_v25 = vld [vmem:[#allocation2 + $0x144] ss:$8 sps:$4 sm:$0xff]  }
 0x2da   :  { %v402_v29 = vsub.f32 %v400_v27, %v401_v28  ;;  %v1998_v27 = vld [vmem:[#allocation2 + $0x154] ss:$8 sps:$4 sm:$0xff]   ;;  %v1996_v28 = vld [vmem:[#allocation2 + $0x150] ss:$8 sps:$4 sm:$0xff]  }
 0x2dc   :  { %v403_v30 = vmax.f32 %v402_v29, 0.0  ;;  %v2001_v29 = vld [vmem:[#allocation2 + $0x164] ss:$8 sps:$4 sm:$0xff]  }
 0x2de   :  { %v404_v31 = vadd.f32 1e-05, %v403_v30  ;;  %v1999_v30 = vld [vmem:[#allocation2 + $0x160] ss:$8 sps:$4 sm:$0xff]  }
 0x2e0   :  { %2069 = vrsqrt.f32 %v404_v31  ;;  %v2004_v31 = vld [vmem:[#allocation2 + $0x174] ss:$8 sps:$4 sm:$0xff]  }
 0x2ea   :  { %v2070_v34 = vpop.eup %2069 }
 0x2eb   :  { %v406_v35 = vmul.f32 %v2070_v34, %v44_v33  ;;  %v2007_v34 = vld [vmem:[#allocation2 + $0x184] ss:$8 sps:$4 sm:$0xff]  }
 0x2ed   :  { %v407_v36 = vmul.f32 %v406_v35, %v399_v26  ;;  %v415_v37 = vrot.slane %v406_v35, %v2211_v62  ;;  %v1993_v26 = vld [vmem:[#allocation2 + $0x140] ss:$8 sps:$4 sm:$0xff]  }
 0x2ee   :  { %v2005_v35 = vld [vmem:[#allocation2 + $0x180] ss:$8 sps:$4 sm:$0xff]  }
 0x2ef   :  { %v409_v38 = vrot.slane %v407_v36, 7  ;;  %v416_v39 = vmul.f32 %v415_v37, %v376_v4  ;;  %v417_v40 = vmul.f32 %v415_v37, %v379_v7  ;;  %v2010_v36 = vld [vmem:[#allocation2 + $0x194] ss:$8 sps:$4 sm:$0xff]   ;;  %v2008_v37 = vld [vmem:[#allocation2 + $0x190] ss:$8 sps:$4 sm:$0xff]  }
 0x2f1   :  { %v411_v41 = vsub.f32 %v44_v33, %v409_v38  ;;  %v2002_v33 = vld [vmem:[#allocation2 + $0x170] ss:$8 sps:$4 sm:$0xff]   ;;  %v2013_v38 = vld [vmem:[#allocation2 + $0x1a4] ss:$8 sps:$4 sm:$0xff]  }
 0x2f3   :  { %v421_v42 = vrot.slane %v411_v41, %v2214_v2  ;;  %v2014_v41 = vld [vmem:[#allocation2 + $0x1b0] ss:$8 sps:$4 sm:$0xff]  }
 0x2f5   :  { %v422_v43 = vadd.f32 %v421_v42, %v416_v39  ;;  %v423_v44 = vadd.f32 %v421_v42, %v417_v40  ;;  %v2011_v39 = vld [vmem:[#allocation2 + $0x1a0] ss:$8 sps:$4 sm:$0xff]   ;;  %v2016_v40 = vld [vmem:[#allocation2 + $0x1b4] ss:$8 sps:$4 sm:$0xff]   ;;  %v2019_v42 = vld [vmem:[#allocation2 + $0x1c4] ss:$8 sps:$4 sm:$0xff]  }
 0x2f7   :  { %v425_v45 = vmax.f32 %v423_v44, 0.0  ;;  %v424_v46 = vmax.f32 %v422_v43, 0.0  ;;  %v2017_v43 = vld [vmem:[#allocation2 + $0x1c0] ss:$8 sps:$4 sm:$0xff]   ;;  %v2022_v44 = vld [vmem:[#allocation2 + $0x1d4] ss:$8 sps:$4 sm:$0xff]  }
 0x2f9   :  { %v1814_v47 = vpack.c.bf16 %v425_v45, %v425_v45  ;;  %v426_v48 = vpack.c.bf16 %v425_v45, %v424_v46  ;;  %v1813_v49 = vpack.c.bf16 %v424_v46, %v424_v46  ;;  %v2020_v45 = vld [vmem:[#allocation2 + $0x1d0] ss:$8 sps:$4 sm:$0xff]   ;;  %v2025_v46 = vld [vmem:[#allocation2 + $0x1e4] ss:$8 sps:$4 sm:$0xff]  }
 0x2fb   :  { %v447_v50 = vsel %vm432_vm4, %v1814_v47, 4286644096  ;;  %v434_v51 = vsel %vm432_vm4, %v1813_v49, 4286644096  ;;  %588 = vmatmul.mubr.bf16.vlgmr.msra.gmra.mrb[4].mxu0 %v426_v48  ;;  %v2023_v47 = vld [vmem:[#allocation2 + $0x1e0] ss:$8 sps:$4 sm:$0xff]  }
 0x2fc   :  { %v449_v52 = vunpack.i.l.bf16 %v447_v50  ;;  %v450_v53 = vunpack.i.h.bf16 %v447_v50  ;;  %v436_v54 = vunpack.i.l.bf16 %v434_v51  ;;  %v437_v55 = vunpack.i.h.bf16 %v434_v51  ;;  %v2028_v48 = vld [vmem:[#allocation2 + $0x1f4] ss:$8 sps:$4 sm:$0xff]   ;;  %v2026_v49 = vld [vmem:[#allocation2 + $0x1f0] ss:$8 sps:$4 sm:$0xff]   ;;  %v2031_v50 = vld [vmem:[#allocation2 + $0x284] ss:$8 sps:$4 sm:$0xff]  }
 0x2fe   :  { %v451_v56 = vmax.f32 %v449_v52, %v450_v53  ;;  %v438_v57 = vmax.f32 %v436_v54, %v437_v55 }
 0x300   :  { %v452_v58 = vrot.slane %v451_v56, 4  ;;  %v439_v59 = vrot.slane %v438_v57, 4 }
 0x302   :  { %v453_v60 = vmax.f32 %v451_v56, %v452_v58  ;;  %v440_v61 = vmax.f32 %v438_v57, %v439_v59 }
 0x304   :  { %v454_v63 = vrot.slane %v453_v60, 2  ;;  %v441_v0 = vrot.slane %v440_v61, 2 }
 0x306   :  { %v442_v3 = vmax.f32 %v440_v61, %v441_v0  ;;  %v455_v4 = vmax.f32 %v453_v60, %v454_v63 }
 0x308   :  { %v443_v5 = vrot.slane %v442_v3, 1  ;;  %v456_v7 = vrot.slane %v455_v4, 1 }
 0x30a   :  { %v444_v8 = vmax.f32 %v442_v3, %v443_v5  ;;  %v457_v9 = vmax.f32 %v455_v4, %v456_v7 }
 0x30c   :  { %v445_v10 = vpack.i.bf16 %v444_v8, %v444_v8  ;;  %v458_v12 = vpack.i.bf16 %v457_v9, %v457_v9 }
 0x30e   :  { %v798_v13 = vunpack.c.l.b16 %v445_v10  ;;  %v799_v15 = vunpack.c.l.b16 %v458_v12 }
 0x310   :  { %v801_v16 = vsel %vm800_vm3, %v799_v15, %v798_v13 }
 0x311   :  { %v802_v17 = vpack.c.b16 %v801_v16, %v801_v16 }
 0x313   :  { %917 = vmatmul.mubr.bf16.vlgmr.msra.gmra.mrb[4].mxu1 %v802_v17 }
 0x314   :  { %1100 = vmatpush1.bf16.msra.mxu1 %v1981_v14 }
 0x315   :  { %1101 = vmatprep.subr.bf16.mxu1 %v1986_v19 }
 0x318   :  { %1102 = vmatpush1.bf16.msra.mxu1 %v1984_v20 }
 0x319   :  { %1103 = vmatprep.subr.bf16.mxu1 %v1989_v21 }
 0x31c   :  { %1104 = vmatpush1.bf16.msra.mxu1 %v1987_v22 }
 0x31d   :  { %1105 = vmatprep.subr.bf16.mxu1 %v1992_v23 }
 0x320   :  { %1106 = vmatpush1.bf16.msra.mxu1 %v1990_v24 }
 0x321   :  { %1107 = vmatprep.subr.bf16.mxu1 %v1995_v25 }
 0x324   :  { %1108 = vmatpush1.bf16.msra.mxu1 %v1993_v26 }
 0x325   :  { %1109 = vmatprep.subr.bf16.mxu1 %v1998_v27 }
 0x328   :  { %1110 = vmatpush1.bf16.msra.mxu1 %v1996_v28 }
 0x329   :  { %1111 = vmatprep.subr.bf16.mxu1 %v2001_v29 }
 0x32c   :  { %1112 = vmatpush1.bf16.msra.mxu1 %v1999_v30 }
 0x32d   :  { %1113 = vmatprep.subr.bf16.mxu1 %v2004_v31 }
 0x330   :  { %1114 = vmatpush1.bf16.msra.mxu1 %v2002_v33 }
 0x331   :  { %1115 = vmatprep.subr.bf16.mxu1 %v2007_v34 }
 0x334   :  { %1116 = vmatpush1.bf16.msra.mxu1 %v2005_v35 }
 0x335   :  { %1117 = vmatprep.subr.bf16.mxu1 %v2010_v36 }
 0x338   :  { %1118 = vmatpush1.bf16.msra.mxu1 %v2008_v37 }
 0x339   :  { %1119 = vmatprep.subr.bf16.mxu1 %v2013_v38 }
 0x33c   :  { %1120 = vmatpush1.bf16.msra.mxu1 %v2011_v39 }
 0x33d   :  { %1121 = vmatprep.subr.bf16.mxu1 %v2016_v40 }
 0x340   :  { %1122 = vmatpush1.bf16.msra.mxu1 %v2014_v41  ;;  %v45_v41 = vld [vmem:[#allocation4 + $0x18] sm:$0xff] }
 0x341   :  { %1123 = vmatprep.subr.bf16.mxu1 %v2019_v42  ;;  %v46_v42 = vld [vmem:[#allocation4 + $0x20] sm:$0xff] }
 0x344   :  { %1124 = vmatpush1.bf16.msra.mxu1 %v2017_v43 }
 0x345   :  { %1125 = vmatprep.subr.bf16.mxu1 %v2022_v44 }
 0x348   :  { %1126 = vmatpush1.bf16.msra.mxu1 %v2020_v45 }
 0x349   :  { %1127 = vmatprep.subr.bf16.mxu1 %v2025_v46 }
 0x34c   :  { %1128 = vmatpush1.bf16.msra.mxu1 %v2023_v47 }
 0x34d   :  { %1129 = vmatprep.subr.bf16.mxu1 %v2028_v48 }
 0x350   :  { %1130 = vmatpush1.bf16.msra.mxu1 %v2026_v49 }
 0x351   :  { %1197 = vmatprep.subr.bf16.mxu1 %v2031_v50 }
 0x3ce   :  { %v589_v51 = vpop.f32.mrb[4].mxu0 }
 0x3cf   :  { %v2239_v52 = vpop.f32.mrb[5].mxu0  ;;  %v612_v54 = vmul.f32 %v589_v51, %v589_v51 }
 0x3d0   :  { %v593_v53 = vpop.f32.mrb[6].mxu0  ;;  %v613_v58 = vmul.f32 %v2239_v52, %v2239_v52 }
 0x3d1   :  { %v598_v55 = vadd.f32 %v593_v53, %v589_v51  ;;  %v614_v56 = vmul.f32 %v593_v53, %v593_v53  ;;  %v595_v57 = vpop.f32.mrb[7].mxu0 }
 0x3d2   :  { %v605_v59 = vadd.f32 %v595_v57, %v2239_v52  ;;  %v615_v60 = vmul.f32 %v595_v57, %v595_v57 }
 0x3d3   :  { %v599_v61 = vrot.slane %v598_v55, 4  ;;  %v616_v63 = vadd.f32 %v614_v56, %v612_v54 }
 0x3d4   :  { %v606_v0 = vrot.slane %v605_v59, 4  ;;  %v623_v3 = vadd.f32 %v615_v60, %v613_v58 }
 0x3d5   :  { %v600_v4 = vadd.f32 %v599_v61, %v598_v55  ;;  %v617_v5 = vrot.slane %v616_v63, 4 }
 0x3d6   :  { %v607_v7 = vadd.f32 %v606_v0, %v605_v59  ;;  %v624_v8 = vrot.slane %v623_v3, 4 }
 0x3d7   :  { %v601_v9 = vrot.slane %v600_v4, 2  ;;  %v618_v10 = vadd.f32 %v617_v5, %v616_v63 }
 0x3d8   :  { %v608_v12 = vrot.slane %v607_v7, 2  ;;  %v625_v13 = vadd.f32 %v624_v8, %v623_v3 }
 0x3d9   :  { %v602_v15 = vadd.f32 %v601_v9, %v600_v4  ;;  %v619_v16 = vrot.slane %v618_v10, 2 }
 0x3da   :  { %v609_v17 = vadd.f32 %v608_v12, %v607_v7  ;;  %v626_v18 = vrot.slane %v625_v13, 2 }
 0x3db   :  { %v603_v14 = vrot.slane %v602_v15, 1  ;;  %v620_v19 = vadd.f32 %v619_v16, %v618_v10 }
 0x3dc   :  { %v610_v20 = vrot.slane %v609_v17, 1  ;;  %v627_v21 = vadd.f32 %v626_v18, %v625_v13 }
 0x3dd   :  { %v604_v22 = vadd.f32 %v603_v14, %v602_v15  ;;  %v621_v23 = vrot.slane %v620_v19, 1 }
 0x3de   :  { %v611_v24 = vadd.f32 %v610_v20, %v609_v17  ;;  %v628_v25 = vrot.slane %v627_v21, 1 }
 0x3df   :  { %v622_v26 = vadd.f32 %v621_v23, %v620_v19  ;;  %v630_v27 = vmul.f32 0.0625, %v604_v22 }
 0x3e0   :  { %v629_v28 = vadd.f32 %v628_v25, %v627_v21  ;;  %v631_v29 = vmul.f32 0.0625, %v611_v24 }
 0x3e1   :  { %v632_v30 = vmul.f32 0.0625, %v622_v26  ;;  %v634_v31 = vmul.f32 %v630_v27, %v630_v27 }
 0x3e2   :  { %v633_v33 = vmul.f32 0.0625, %v629_v28  ;;  %v635_v34 = vmul.f32 %v631_v29, %v631_v29 }
 0x3e3   :  { %v636_v35 = vsub.f32 %v632_v30, %v634_v31 }
 0x3e4   :  { %v637_v36 = vsub.f32 %v633_v33, %v635_v34 }
 0x3e5   :  { %v638_v37 = vmax.f32 %v636_v35, 0.0 }
 0x3e6   :  { %v639_v38 = vmax.f32 %v637_v36, 0.0 }
 0x3e7   :  { %v640_v39 = vadd.f32 1e-05, %v638_v37 }
 0x3e8   :  { %v641_v40 = vadd.f32 1e-05, %v639_v38 }
 0x3e9   :  { %2071 = vrsqrt.f32 %v640_v39 }
 0x3ea   :  { %2073 = vrsqrt.f32 %v641_v40 }
 0x3f3   :  { %v2072_v43 = vpop.eup %2071 }
 0x3f4   :  { %v2074_v44 = vpop.eup %2073  ;;  %v644_v45 = vmul.f32 %v2072_v43, %v45_v41 }
 0x3f5   :  { %v645_v46 = vmul.f32 %v2074_v44, %v46_v42 }
 0x3f6   :  { %v646_v47 = vmul.f32 %v644_v45, %v630_v27  ;;  %v659_v48 = vrot.slane %v644_v45, %v2211_v62 }
 0x3f7   :  { %v647_v49 = vmul.f32 %v645_v46, %v631_v29  ;;  %v663_v50 = vrot.slane %v645_v46, %v2211_v62 }
 0x3f8   :  { %v650_v54 = vrot.slane %v646_v47, 7  ;;  %v664_v55 = vmul.f32 %v659_v48, %v589_v51  ;;  %v666_v56 = vmul.f32 %v659_v48, %v593_v53 }
 0x3f9   :  { %v651_v58 = vrot.slane %v647_v49, 7  ;;  %v665_v59 = vmul.f32 %v663_v50, %v2239_v52  ;;  %v667_v60 = vmul.f32 %v663_v50, %v595_v57 }
 0x3fa   :  { %v654_v61 = vsub.f32 %v45_v41, %v650_v54 }
 0x3fb   :  { %v655_v63 = vsub.f32 %v46_v42, %v651_v58 }
 0x3fc   :  { %v671_v0 = vrot.slane %v654_v61, %v2214_v2 }
 0x3fd   :  { %v675_v3 = vrot.slane %v655_v63, %v2214_v2 }
 0x3fe   :  { %v676_v4 = vadd.f32 %v671_v0, %v664_v55  ;;  %v678_v5 = vadd.f32 %v671_v0, %v666_v56 }
 0x3ff   :  { %v677_v7 = vadd.f32 %v675_v3, %v665_v59  ;;  %v679_v8 = vadd.f32 %v675_v3, %v667_v60 }
 0x400   :  { %v680_v9 = vmax.f32 %v676_v4, 0.0  ;;  %v682_v10 = vmax.f32 %v678_v5, 0.0 }
 0x401   :  { %v681_v12 = vmax.f32 %v677_v7, 0.0  ;;  %v683_v13 = vmax.f32 %v679_v8, 0.0 }
 0x402   :  { %v1815_v51 = vpack.c.bf16 %v680_v9, %v680_v9  ;;  %v1817_v53 = vpack.c.bf16 %v682_v10, %v682_v10  ;;  %v2029_v10 = vld [vmem:[#allocation2 + $0x280] ss:$8 sps:$4 sm:$0xff]  }
 0x403   :  { %v1816_v15 = vpack.c.bf16 %v681_v12, %v681_v12  ;;  %v1818_v16 = vpack.c.bf16 %v683_v13, %v683_v13  ;;  %v2034_v13 = vld [vmem:[#allocation2 + $0x294] ss:$8 sps:$4 sm:$0xff]  }
 0x404   :  { %v697_v52 = vsel %vm432_vm4, %v1815_v51, 4286644096  ;;  %v723_v57 = vsel %vm432_vm4, %v1817_v53, 4286644096  ;;  %v2032_v51 = vld [vmem:[#allocation2 + $0x290] ss:$8 sps:$4 sm:$0xff]  }
 0x405   :  { %v699_v17 = vunpack.i.l.bf16 %v697_v52  ;;  %v700_v18 = vunpack.i.h.bf16 %v697_v52  ;;  %v725_v14 = vunpack.i.l.bf16 %v723_v57  ;;  %v726_v19 = vunpack.i.h.bf16 %v723_v57  ;;  %v2037_v53 = vld [vmem:[#allocation2 + $0x2a4] ss:$8 sps:$4 sm:$0xff]   ;;  %v2038_v52 = vld [vmem:[#allocation2 + $0x2b0] ss:$8 sps:$4 sm:$0xff]  }
 0x406   :  { %v710_v20 = vsel %vm432_vm4, %v1816_v15, 4286644096  ;;  %v736_v21 = vsel %vm432_vm4, %v1818_v16, 4286644096  ;;  %v2035_v15 = vld [vmem:[#allocation2 + $0x2a0] ss:$8 sps:$4 sm:$0xff]   ;;  %v1153_v57 = vpack.c.b16 %v2232_v32, %v2232_v32 }
 0x407   :  { %v701_v22 = vmax.f32 %v699_v17, %v700_v18  ;;  %v727_v23 = vmax.f32 %v725_v14, %v726_v19  ;;  %v712_v24 = vunpack.i.l.bf16 %v710_v20  ;;  %v713_v25 = vunpack.i.h.bf16 %v710_v20  ;;  %v2040_v16 = vld [vmem:[#allocation2 + $0x2b4] ss:$8 sps:$4 sm:$0xff]   ;;  %v2041_v17 = vld [vmem:[#allocation2 + $0x340] ss:$8 sps:$4 sm:$0xff]   ;;  %v2044_v14 = vld [vmem:[#allocation2 + $0x2d0] ss:$8 sps:$4 sm:$0xff]  }
 0x408   :  { %v738_v26 = vunpack.i.l.bf16 %v736_v21  ;;  %v739_v27 = vunpack.i.h.bf16 %v736_v21  ;;  %v2042_v18 = vld [vmem:[#allocation2 + $0x2c0] ss:$8 sps:$4 sm:$0xff]   ;;  %1829 = vmatprep.subr.bf16.mxu0 %v2041_v17  ;;  %v2047_v21 = vld [vmem:[#allocation2 + $0x370] ss:$8 sps:$4 sm:$0xff]  }
 0x409   :  { %v702_v28 = vrot.slane %v701_v22, 4  ;;  %v728_v29 = vrot.slane %v727_v23, 4  ;;  %v714_v30 = vmax.f32 %v712_v24, %v713_v25  ;;  %1830 = vmatpush3.bf16.msra.mxu0 %v2042_v18  ;;  %v2045_v19 = vld [vmem:[#allocation2 + $0x360] ss:$8 sps:$4 sm:$0xff]   ;;  %v2051_v24 = vld [vmem:[#allocation2 + $0x390] ss:$8 sps:$4 sm:$0xff]  }
 0x40a   :  { %v740_v31 = vmax.f32 %v738_v26, %v739_v27  ;;  %v2046_v20 = vld [vmem:[#allocation2 + $0x2e0] ss:$8 sps:$4 sm:$0xff]   ;;  %v2052_v25 = vld [vmem:[#allocation2 + $0x310] ss:$8 sps:$4 sm:$0xff]  }
 0x40b   :  { %v729_v33 = vmax.f32 %v727_v23, %v728_v29  ;;  %v715_v34 = vrot.slane %v714_v30, 4  ;;  %v703_v35 = vmax.f32 %v701_v22, %v702_v28  ;;  %v2048_v22 = vld [vmem:[#allocation2 + $0x2f0] ss:$8 sps:$4 sm:$0xff]   ;;  %v2049_v23 = vld [vmem:[#allocation2 + $0x380] ss:$8 sps:$4 sm:$0xff]  }
 0x40c   :  { %v741_v36 = vrot.slane %v740_v31, 4  ;;  %v2050_v32 = vld [vmem:[#allocation2 + $0x300] ss:$8 sps:$4 sm:$0xff]   ;;  %v2055_v28 = vld [vmem:[#allocation2 + $0x3b0] ss:$8 sps:$4 sm:$0xff]  }
 0x40d   :  { %v730_v37 = vrot.slane %v729_v33, 2  ;;  %v716_v38 = vmax.f32 %v714_v30, %v715_v34  ;;  %v704_v39 = vrot.slane %v703_v35, 2  ;;  %v2053_v26 = vld [vmem:[#allocation2 + $0x3a0] ss:$8 sps:$4 sm:$0xff]   ;;  %v2056_v29 = vld [vmem:[#allocation2 + $0x330] ss:$8 sps:$4 sm:$0xff]  }
 0x40e   :  { %v742_v40 = vmax.f32 %v740_v31, %v741_v36  ;;  %v2054_v27 = vld [vmem:[#allocation2 + $0x320] ss:$8 sps:$4 sm:$0xff]  }
 0x40f   :  { %v717_v41 = vrot.slane %v716_v38, 2  ;;  %v705_v42 = vmax.f32 %v703_v35, %v704_v39  ;;  %v731_v43 = vmax.f32 %v729_v33, %v730_v37 }
 0x410   :  { %v743_v44 = vrot.slane %v742_v40, 2 }
 0x411   :  { %v718_v45 = vmax.f32 %v716_v38, %v717_v41  ;;  %v706_v46 = vrot.slane %v705_v42, 1  ;;  %v732_v47 = vrot.slane %v731_v43, 1 }
 0x412   :  { %v744_v48 = vmax.f32 %v742_v40, %v743_v44 }
 0x413   :  { %v719_v49 = vrot.slane %v718_v45, 1  ;;  %v707_v50 = vmax.f32 %v705_v42, %v706_v46  ;;  %v733_v54 = vmax.f32 %v731_v43, %v732_v47 }
 0x414   :  { %v745_v55 = vrot.slane %v744_v48, 1 }
 0x415   :  { %v720_v56 = vmax.f32 %v718_v45, %v719_v49  ;;  %v708_v58 = vpack.i.bf16 %v707_v50, %v707_v50  ;;  %v734_v59 = vpack.i.bf16 %v733_v54, %v733_v54 }
 0x416   :  { %v746_v60 = vmax.f32 %v744_v48, %v745_v55 }
 0x417   :  { %v721_v61 = vpack.i.bf16 %v720_v56, %v720_v56  ;;  %v929_v63 = vunpack.c.l.b16 %v708_v58  ;;  %v931_v0 = vunpack.c.l.b16 %v734_v59 }
 0x418   :  { %v747_v3 = vpack.i.bf16 %v746_v60, %v746_v60 }
 0x419   :  { %v930_v4 = vunpack.c.l.b16 %v721_v61  ;;  %v933_v5 = vsel %vm800_vm3, %v931_v0, %v929_v63 }
 0x41a   :  { %v932_v7 = vunpack.c.l.b16 %v747_v3  ;;  %v935_v12 = vpack.c.b16 %v933_v5, %v933_v5 }
 0x41c   :  { %v934_v8 = vsel %vm800_vm3, %v932_v7, %v930_v4 }
 0x41d   :  { %v936_v9 = vpack.c.b16 %v934_v8, %v934_v8 }
 0x41f   :  { %1131 = vmatprep.mubr.bf16.mxu1 %v936_v9 }
 0x420   :  { %1132 = vmatmul.mubr.bf16.vlgmr.msra.gmra.mrb[4].mxu1 %v935_v12 }
 0x421   :  { %1198 = vmatpush1.bf16.msra.mxu1 %v2029_v10  ;;  %1229 = vmatprep.mubr.bf16.mxu1 %v2137_v1  ;;  %v2043_v1 = vld [vmem:[#allocation2 + $0x350] ss:$8 sps:$4 sm:$0xff]  }
 0x422   :  { %1199 = vmatprep.subr.bf16.mxu1 %v2034_v13  ;;  %1831 = vmatprep.subr.bf16.mxu0 %v2043_v1  ;;  %v47_v1 = vld [vmem:[#allocation4 + $0x28] sm:$0xff] }
 0x423   :  { %1832 = vmatpush3.bf16.msra.mxu0 %v2044_v14  ;;  %v48_v14 = vld [vmem:[#allocation4 + $0x30] sm:$0xff] }
 0x424   :  { %1833 = vmatprep.subr.bf16.mxu0 %v2045_v19 }
 0x425   :  { %1200 = vmatpush1.bf16.msra.mxu1 %v2032_v51 }
 0x426   :  { %1201 = vmatprep.subr.bf16.mxu1 %v2037_v53 }
 0x427   :  { %1834 = vmatpush3.bf16.msra.mxu0 %v2046_v20 }
 0x428   :  { %1835 = vmatprep.subr.bf16.mxu0 %v2047_v21 }
 0x429   :  { %1202 = vmatpush1.bf16.msra.mxu1 %v2035_v15 }
 0x42a   :  { %1203 = vmatprep.subr.bf16.mxu1 %v2040_v16 }
 0x42b   :  { %1836 = vmatpush3.bf16.msra.mxu0 %v2048_v22 }
 0x42c   :  { %1837 = vmatprep.subr.bf16.mxu0 %v2049_v23 }
 0x42d   :  { %1204 = vmatpush1.bf16.msra.mxu1 %v2038_v52 }
 0x42f   :  { %1838 = vmatpush3.bf16.msra.mxu0 %v2050_v32 }
 0x430   :  { %1786 = vmatmul.mubr.msk.bf16.vlgmr.msra.gmra.mrb[4].mxu1 %vm101_vm1, %v1153_v57  ;;  %1839 = vmatprep.subr.bf16.mxu0 %v2051_v24 }
 0x433   :  { %1840 = vmatpush3.bf16.msra.mxu0 %v2052_v25 }
 0x434   :  { %1841 = vmatprep.subr.bf16.mxu0 %v2053_v26 }
 0x437   :  { %1842 = vmatpush3.bf16.msra.mxu0 %v2054_v27 }
 0x438   :  { %1843 = vmatprep.subr.bf16.mxu0 %v2055_v28 }
 0x43b   :  { %1844 = vmatpush3.bf16.msra.mxu0 %v2056_v29 }
 0x43c   :  { %1884 = vmatprep.subr.bf16.mxu0 %v2139_v6 }
 0x503   :  { %v1231_v30 = vpop.f32.mrb[4].mxu1 }
 0x504   :  { %v1241_v31 = vsel %vm1240_vm5, %v1231_v30, 0.0  ;;  %v1255_v33 = vmul.f32 %v1231_v30, %v1231_v30  ;;  %v1233_v34 = vpop.f32.mrb[5].mxu1 }
 0x505   :  { %v1242_v35 = vrot.slane %v1241_v31, 4  ;;  %v1248_v36 = vsel %vm1240_vm5, %v1233_v34, 0.0  ;;  %v1256_v37 = vmul.f32 %v1233_v34, %v1233_v34  ;;  %v1235_v38 = vpop.f32.mrb[6].mxu1 }
 0x506   :  { %v1257_v39 = vsel %vm1240_vm5, %v1255_v33, 0.0  ;;  %v1249_v40 = vrot.slane %v1248_v36, 4  ;;  %v1236_v41 = vpop.f32.mrb[7].mxu1 }
 0x507   :  { %v1243_v42 = vadd.f32 %v1242_v35, %v1241_v31  ;;  %v1258_v43 = vrot.slane %v1257_v39, 4  ;;  %v1264_v44 = vsel %vm1240_vm5, %v1256_v37, 0.0 }
 0x508   :  { %v1250_v45 = vadd.f32 %v1249_v40, %v1248_v36  ;;  %v1265_v46 = vrot.slane %v1264_v44, 4 }
 0x509   :  { %v1244_v47 = vrot.slane %v1243_v42, 2  ;;  %v1259_v48 = vadd.f32 %v1258_v43, %v1257_v39  ;;  %v2057_v43 = vld [vmem:[#allocation2 + $0x3c0] ss:$8 sps:$4 sm:$0xff]  }
 0x50a   :  { %v1251_v49 = vrot.slane %v1250_v45, 2  ;;  %v1266_v50 = vadd.f32 %v1265_v46, %v1264_v44  ;;  %v2060_v44 = vld [vmem:[#allocation2 + $0x3f0] ss:$8 sps:$4 sm:$0xff]  }
 0x50b   :  { %v1245_v54 = vadd.f32 %v1244_v47, %v1243_v42  ;;  %v1260_v55 = vrot.slane %v1259_v48, 2  ;;  %v2062_v46 = vld [vmem:[#allocation2 + $0x410] ss:$8 sps:$4 sm:$0xff]   ;;  %v2063_v47 = vld [vmem:[#allocation2 + $0x420] ss:$8 sps:$4 sm:$0xff]  }
 0x50c   :  { %v1252_v56 = vadd.f32 %v1251_v49, %v1250_v45  ;;  %v1267_v58 = vrot.slane %v1266_v50, 2  ;;  %v2061_v45 = vld [vmem:[#allocation2 + $0x400] ss:$8 sps:$4 sm:$0xff]  }
 0x50d   :  { %v1246_v59 = vrot.slane %v1245_v54, 1  ;;  %v1261_v60 = vadd.f32 %v1260_v55, %v1259_v48  ;;  %v2064_v48 = vld [vmem:[#allocation2 + $0x430] ss:$8 sps:$4 sm:$0xff]  }
 0x50e   :  { %v1253_v61 = vrot.slane %v1252_v56, 1  ;;  %v1268_v63 = vadd.f32 %v1267_v58, %v1266_v50 }
 0x50f   :  { %v1247_v0 = vadd.f32 %v1246_v59, %v1245_v54  ;;  %v1262_v3 = vrot.slane %v1261_v60, 1 }
 0x510   :  { %v1254_v4 = vadd.f32 %v1253_v61, %v1252_v56  ;;  %v1269_v5 = vrot.slane %v1268_v63, 1 }
 0x511   :  { %v1263_v7 = vadd.f32 %v1262_v3, %v1261_v60  ;;  %v1271_v8 = vmul.f32 0.5, %v1247_v0 }
 0x512   :  { %v1270_v9 = vadd.f32 %v1269_v5, %v1268_v63  ;;  %v1272_v10 = vmul.f32 0.5, %v1254_v4 }
 0x513   :  { %v1273_v12 = vmul.f32 0.5, %v1263_v7  ;;  %v1275_v13 = vmul.f32 %v1271_v8, %v1271_v8 }
 0x514   :  { %v1274_v51 = vmul.f32 0.5, %v1270_v9  ;;  %v1276_v53 = vmul.f32 %v1272_v10, %v1272_v10 }
 0x515   :  { %v1277_v15 = vsub.f32 %v1273_v12, %v1275_v13 }
 0x516   :  { %v1278_v16 = vsub.f32 %v1274_v51, %v1276_v53 }
 0x517   :  { %v1279_v52 = vmax.f32 %v1277_v15, 0.0 }
 0x518   :  { %v1280_v57 = vmax.f32 %v1278_v16, 0.0 }
 0x519   :  { %v1281_v17 = vadd.f32 1e-05, %v1279_v52 }
 0x51a   :  { %v1282_v18 = vadd.f32 1e-05, %v1280_v57  ;;  %v49_v57 = vld [vmem:[#allocation4 + $0x38] sm:$0xff] }
 0x51b   :  { %2075 = vrsqrt.f32 %v1281_v17 }
 0x51c   :  { %2077 = vrsqrt.f32 %v1282_v18 }
 0x525   :  { %v2076_v19 = vpop.eup %2075 }
 0x526   :  { %v2078_v20 = vpop.eup %2077  ;;  %v1285_v21 = vmul.f32 %v2076_v19, %v47_v1 }
 0x527   :  { %v1286_v22 = vmul.f32 %v2078_v20, %v48_v14 }
 0x528   :  { %v1287_v23 = vmul.f32 %v1285_v21, %v1271_v8  ;;  %v1300_v25 = vrot.slane %v1285_v21, %v2211_v62 }
 0x529   :  { %v1288_v32 = vmul.f32 %v1286_v22, %v1272_v10  ;;  %v1304_v27 = vrot.slane %v1286_v22, %v2211_v62 }
 0x52a   :  { %v1291_v24 = vrot.slane %v1287_v23, 7  ;;  %v1305_v31 = vmul.f32 %v1300_v25, %v1231_v30  ;;  %v2058_v30 = vld [vmem:[#allocation2 + $0x3d0] ss:$8 sps:$4 sm:$0xff]  }
 0x52b   :  { %v1292_v26 = vrot.slane %v1288_v32, 7  ;;  %v1306_v35 = vmul.f32 %v1304_v27, %v1233_v34  ;;  %v2059_v34 = vld [vmem:[#allocation2 + $0x3e0] ss:$8 sps:$4 sm:$0xff]  }
 0x52c   :  { %v1295_v28 = vsub.f32 %v47_v1, %v1291_v24 }
 0x52d   :  { %v1296_v29 = vsub.f32 %v48_v14, %v1292_v26 }
 0x52e   :  { %v1310_v33 = vrot.slane %v1295_v28, %v2214_v2 }
 0x52f   :  { %v1314_v36 = vrot.slane %v1296_v29, %v2214_v2 }
 0x530   :  { %v1315_v37 = vadd.f32 %v1310_v33, %v1305_v31 }
 0x531   :  { %v1316_v38 = vadd.f32 %v1314_v36, %v1306_v35 }
 0x532   :  { %v1317_v39 = vmax.f32 %v1315_v37, 0.0 }
 0x533   :  { %v1318_v40 = vmax.f32 %v1316_v38, 0.0 }
 0x534   :  { %v1319_v42 = vpack.c.bf16 %v1317_v39, %v1317_v39 }
 0x535   :  { %v1320_v41 = vpack.c.bf16 %v1318_v40, %v1318_v40 }
 0x537   :  { %1481 = vmatprep.mubr.bf16.mxu0 %v1320_v41 }
 0x538   :  { %1482 = vmatmul.mubr.bf16.vlgmr.msra.gmra.mrb[8].mxu0 %v1319_v42 }
 0x539   :  { %1900 = vmatprep.mubr.msk.bf16.mxu0 %vm2140_vm0, %v2139_v6  ;;  %1885 = vmatpush3.bf16.msra.mxu0 %v2057_v43 }
 0x53a   :  { %1886 = vmatprep.subr.bf16.mxu0 %v2139_v6 }
 0x53d   :  { %1887 = vmatpush3.bf16.msra.mxu0 %v2058_v30 }
 0x53e   :  { %1888 = vmatprep.subr.bf16.mxu0 %v2139_v6 }
 0x541   :  { %1889 = vmatpush3.bf16.msra.mxu0 %v2059_v34 }
 0x542   :  { %1890 = vmatprep.subr.bf16.mxu0 %v2139_v6 }
 0x545   :  { %1891 = vmatpush3.bf16.msra.mxu0 %v2060_v44 }
 0x546   :  { %1892 = vmatprep.subr.bf16.mxu0 %v2139_v6 }
 0x549   :  { %1893 = vmatpush3.bf16.msra.mxu0 %v2061_v45 }
 0x54a   :  { %1894 = vmatprep.subr.bf16.mxu0 %v2139_v6 }
 0x54d   :  { %1895 = vmatpush3.bf16.msra.mxu0 %v2062_v46 }
 0x54e   :  { %1896 = vmatprep.subr.bf16.mxu0 %v2139_v6 }
 0x551   :  { %1897 = vmatpush3.bf16.msra.mxu0 %v2063_v47 }
 0x552   :  { %1898 = vmatprep.subr.bf16.mxu0 %v2139_v6 }
 0x555   :  { %1899 = vmatpush3.bf16.msra.mxu0 %v2064_v48 }
 0x60b   :  { %v1845_v49 = vpop.f32.mrb[8].mxu0 }
 0x60c   :  { %v1846_v50 = vpop.f32.mrb[9].mxu0 }
 0x60d   :  { %v1847_v54 = vadd.f32 %v1846_v50, %v1845_v49  ;;  %v1848_v55 = vpop.f32.mrb[10].mxu0 }
 0x60e   :  { %v1849_v56 = vpop.f32.mrb[11].mxu0 }
 0x60f   :  { %v1489_v58 = vsel %vm1240_vm5, %v1847_v54, 0.0  ;;  %v1496_v59 = vmul.f32 %v1847_v54, %v1847_v54 }
 0x610   :  { %v1490_v60 = vrot.slane %v1489_v58, 4 }
 0x611   :  { %v1497_v61 = vsel %vm1240_vm5, %v1496_v59, 0.0 }
 0x612   :  { %v1491_v63 = vadd.f32 %v1490_v60, %v1489_v58  ;;  %v1498_v0 = vrot.slane %v1497_v61, 4 }
 0x614   :  { %v1492_v3 = vrot.slane %v1491_v63, 2  ;;  %v1499_v4 = vadd.f32 %v1498_v0, %v1497_v61 }
 0x616   :  { %v1493_v5 = vadd.f32 %v1492_v3, %v1491_v63  ;;  %v1500_v7 = vrot.slane %v1499_v4, 2 }
 0x618   :  { %v1494_v6 = vrot.slane %v1493_v5, 1  ;;  %v1501_v8 = vadd.f32 %v1500_v7, %v1499_v4  ;;  %v1677_v4 = vsub.s32 5, %v2201_v11 }
 0x61a   :  { %v1495_v9 = vadd.f32 %v1494_v6, %v1493_v5  ;;  %v1502_v10 = vrot.slane %v1501_v8, 1  ;;  %v2083_v6 = vld [vmem:[#allocation4] sm:$0xff] }
 0x61c   :  { %v1503_v12 = vadd.f32 %v1502_v10, %v1501_v8  ;;  %v1504_v13 = vmul.f32 0.5, %v1495_v9  ;;  %v1678_v8 = vrot.slane %v2083_v6, %v1677_v4 }
 0x61e   :  { %v1505_v51 = vmul.f32 0.5, %v1503_v12  ;;  %v1506_v53 = vmul.f32 %v1504_v13, %v1504_v13 }
 0x620   :  { %v1507_v15 = vsub.f32 %v1505_v51, %v1506_v53 }
 0x622   :  { %v1508_v16 = vmax.f32 %v1507_v15, 0.0 }
 0x624   :  { %v1509_v52 = vadd.f32 1e-05, %v1508_v16 }
 0x626   :  { %2079 = vrsqrt.f32 %v1509_v52 }
 0x630   :  { %v2080_v17 = vpop.eup %2079 }
 0x631   :  { %v1511_v18 = vmul.f32 %v2080_v17, %v49_v57 }
 0x633   :  { %v1512_v1 = vmul.f32 %v1511_v18, %v1504_v13  ;;  %v1520_v19 = vrot.slane %v1511_v18, %v2211_v62  ;;  %v1685_v13 = vsub.s32 6, %v2201_v11 }
 0x635   :  { %v1514_v14 = vrot.slane %v1512_v1, 7  ;;  %v1521_v21 = vmul.f32 %v1847_v54, %v1520_v19  ;;  %v50_v54 = vld [vmem:[#allocation4 + $0x40] sm:$0xff]  ;;  %v1686_v51 = vrot.slane %v2083_v6, %v1685_v13 }
 0x637   :  { %v1516_v20 = vsub.f32 %v49_v57, %v1514_v14 }
 0x639   :  { %v1525_v22 = vrot.slane %v1516_v20, %v2214_v2 }
 0x63b   :  { %v1526_v23 = vadd.f32 %v1525_v22, %v1521_v21 }
 0x63d   :  { %v1527_v32 = vmax.f32 %v1526_v23, 0.0 }
 0x63f   :  { %v1528_v24 = vpack.c.bf16 %v1527_v32, %v1527_v32 }
 0x641   :  { %1901 = vmatmul.mubr.bf16.vlgmr.msra.gmra.mrb[12].mxu0 %v1528_v24 }
 0x714   :  { %v1627_v25 = vpop.f32.mrb[12].mxu0 }
 0x715   :  { %v1641_v26 = vmul.f32 %v1627_v25, %v1627_v25  ;;  %v1902_v27 = vpop.f32.mrb[13].mxu0  ;;  %v1634_v28 = vsel %vm1633_vm6, %v1627_v25, 0.0 }
 0x716   :  { %v1630_v29 = vpop.f32.mrb[14].mxu0  ;;  %v1635_v31 = vrot.slane %v1634_v28, 4 }
 0x717   :  { %v1903_v33 = vpop.f32.mrb[15].mxu0  ;;  %v1642_v35 = vsel %vm1633_vm6, %v1641_v26, 0.0 }
 0x718   :  { %v1636_v36 = vadd.f32 %v1635_v31, %v1634_v28  ;;  %v1643_v37 = vrot.slane %v1642_v35, 4 }
 0x71a   :  { %v1637_v38 = vrot.slane %v1636_v36, 2  ;;  %v1644_v39 = vadd.f32 %v1643_v37, %v1642_v35 }
 0x71c   :  { %v1638_v40 = vadd.f32 %v1637_v38, %v1636_v36  ;;  %v1645_v41 = vrot.slane %v1644_v39, 2 }
 0x71e   :  { %v1639_v42 = vrot.slane %v1638_v40, 1  ;;  %v1646_v43 = vadd.f32 %v1645_v41, %v1644_v39 }
 0x720   :  { %v1640_v30 = vadd.f32 %v1639_v42, %v1638_v40  ;;  %v1647_v34 = vrot.slane %v1646_v43, 1 }
 0x722   :  { %v1648_v44 = vadd.f32 %v1647_v34, %v1646_v43  ;;  %v1649_v45 = vmul.f32 0.5, %v1640_v30 }
 0x724   :  { %v1650_v46 = vmul.f32 0.5, %v1648_v44  ;;  %v1651_v47 = vmul.f32 %v1649_v45, %v1649_v45 }
 0x726   :  { %v1652_v48 = vsub.f32 %v1650_v46, %v1651_v47 }
 0x728   :  { %v1653_v49 = vmax.f32 %v1652_v48, 0.0 }
 0x72a   :  { %v1654_v50 = vadd.f32 1e-05, %v1653_v49 }
 0x72c   :  { %2081 = vrsqrt.f32 %v1654_v50 }
 0x736   :  { %v2082_v55 = vpop.eup %2081 }
 0x737   :  { %v1656_v56 = vmul.f32 %v2082_v55, %v50_v54 }
 0x739   :  { %v1657_v58 = vmul.f32 %v1656_v56, %v1649_v45  ;;  %v1665_v60 = vrot.slane %v1656_v56, %v2211_v62 }
 0x73b   :  { %v1659_v59 = vrot.slane %v1657_v58, 7  ;;  %v1666_v63 = vmul.f32 %v1665_v60, %v1627_v25 }
 0x73d   :  { %v1661_v61 = vsub.f32 %v50_v54, %v1659_v59 }
 0x73f   :  { %v1670_v0 = vrot.slane %v1661_v61, %v2214_v2 }
 0x741   :  { %v1671_v3 = vadd.f32 %v1670_v0, %v1666_v63 }
 0x743   :  { %v1672_v5 = vmax.f32 %v1671_v3, 0.0 }
 0x745   :  { %v1673_v7 = vpack.c.bf16 %v1672_v5, %v1672_v5 }
 0x747   :  { %v1674_v9 = vunpack.c.l.bf16 %v1673_v7 }
 0x749   :  { %v1679_v10 = vmul.f32 %v1678_v8, %v1674_v9 }
 0x74b   :  { %v1680_v12 = vsel %vm1633_vm6, %v1679_v10, 0.0 }
 0x74c   :  { %1681 = vadd.xlane.f32.xlu1 %v1680_v12 }
 0x7d9   :  { %v1682_v62 = vpop.xlane.xlu1 %1681 }
 0x7da   :  { %v1687_v53 = vadd.f32 %v1686_v51, %v1682_v62 }
 0x7dc   :  { %1689 = vst.msk [vmem:[%s2294_s3] sm:$0x3] %vm1688_vm7, %v1687_v53 }
 0x7dd   :  { %1694 = vsyncpa [#allocation3], 1 }
 0x7de   :  { %1695 = vsyncpa [#allocation5], 1 }

</bundles_post_ra>
